<compile_context>
chip_gen: v6e
topology: v6e:2x2x1
jax: 0.10.0
libtpu: 0.0.40
codegen_flags: <defaults>
</compile_context>

<pallas_src>
import functools

import jax
import jax.numpy as jnp
from jax import lax
from jax.experimental import pallas as pl
from jax.experimental.pallas import tpu as pltpu


def _round_up(n, m):
    return ((n + m - 1) // m) * m


def _pick_time_tiling(T, max_tile=512):
    """Pick (time_tile, padded_T); T is padded up to nT * tT."""
    if T <= max_tile:
        tT = _round_up(T, 8)
        return tT, tT
    nT = -(-T // max_tile)
    tT = _round_up(-(-T // nT), 64)
    return tT, nT * tT


def _vmem_limit_bytes():
    # ~3/4 of per-core VMEM: ~48 MiB on v7x (64 MiB cores), 96 MiB on v5e/v6e (128 MiB).
    try:
        cap = int(pltpu.get_tpu_info().vmem_capacity_bytes)
    except Exception:
        cap = 64 * 1024 * 1024
    return max(32 * 1024 * 1024, min((cap * 3) // 4, 96 * 1024 * 1024))


def _weight_spec(shape, index_map, single_buffer):
    # Constant-index weights never change blocks, so the second pipeline buffer is pure VMEM
    # waste; single-buffer them when the installed JAX supports pipeline_mode.
    if single_buffer:
        return pl.BlockSpec(shape, index_map, pipeline_mode=pl.Buffered(1))
    return pl.BlockSpec(shape, index_map)


def _depthwise_conv(x_ref, halo_ref, wdw_ref, bdw_ref, *, tT, K, pad):
    """Reflect-padded depthwise conv over one (tT, C) tile.

    Each tap is one XLU sublane roll of the aligned tile; the <= 2*pad rows that wrap around
    are spliced from the 8-row halo block via a select -- no staging copy, no unaligned loads.
    """
    C = x_ref.shape[-1]
    xt = x_ref[...].astype(jnp.float32)                       # (tT, C)
    halo = halo_ref[...].astype(jnp.float32)                  # (8, C): [left(pad) | right(pad) | 0]
    if tT > 8:
        big = jnp.concatenate([halo, jnp.zeros((tT - 8, C), jnp.float32)], axis=0)
    else:
        big = halo
    # hp: right halo at rows [0, pad), left halo at rows [tT - pad, tT) -- exactly where a
    # circular roll of the main tile wraps around.
    hp = pltpu.roll(big, shift=tT - pad, axis=0)
    row = lax.broadcasted_iota(jnp.int32, (tT, 1), 0)

    y = jnp.zeros((tT, C), jnp.float32) + bdw_ref[...].astype(jnp.float32)
    for k in range(K):
        s = pad - k                                           # output row t reads input row t - s
        w_k = wdw_ref[k:k + 1, :].astype(jnp.float32)         # (1, C)
        if s == 0:
            tap = xt
        else:
            if s > 0:                                         # wraps at the top -> left-halo rows
                src = jnp.where(row >= tT - s, hp, xt)
            else:                                             # wraps at the bottom -> right-halo
                src = jnp.where(row < -s, hp, xt)
            tap = pltpu.roll(src, shift=s % tT, axis=0)
        y = y + tap * w_k
    return y


def _gelu_tanh(h):
    # tanh-form GELU: transcendental goes to the EUP slot (erf would be a long f32 VPU
    # polynomial). Difference from the exact erf GELU is far below the bf16 MXU error.
    c0 = jnp.float32(0.7978845608028654)
    c1 = jnp.float32(0.044715)
    return 0.5 * h * (1.0 + jnp.tanh(c0 * (h + c1 * h * h * h)))


def _stats_kernel(x_ref, halo_ref, wdw_ref, bdw_ref, w1_ref, b1_ref,
                  h_ref, ssq_ref, *, tT, K, pad, T_real, T_pad):
    """Pass 1: dwconv -> c1 (bf16 MXU) -> GELU; emit h (bf16) and accumulate sum_t h^2."""
    @pl.when(pl.program_id(1) == 0)
    def _():
        ssq_ref[...] = jnp.zeros_like(ssq_ref)

    y = _depthwise_conv(x_ref, halo_ref, wdw_ref, bdw_ref, tT=tT, K=K, pad=pad)
    h = jnp.dot(y.astype(jnp.bfloat16), w1_ref[...],
                preferred_element_type=jnp.float32) + b1_ref[...].astype(jnp.float32)
    g = _gelu_tanh(h)
    h_ref[...] = g.astype(jnp.bfloat16)

    gsq = g * g
    if T_real < T_pad:  # static: mask padded time rows out of the GRN statistic
        t0 = pl.program_id(1) * tT
        gmask = (t0 + lax.broadcasted_iota(jnp.int32, (tT, 1), 0)) < T_real
        gsq = jnp.where(gmask, gsq, 0.0)
    ssq_ref[...] += jnp.sum(gsq, axis=0, keepdims=True)


def _apply_kernel(h_ref, scale_ref, x_ref, w2_ref, b2_ref, o_ref):
    """Pass 2: scale h by the folded GRN factor, c2 (bf16 MXU), add residual."""
    hs = (h_ref[...].astype(jnp.float32) * scale_ref[...]).astype(jnp.bfloat16)
    out = jnp.dot(hs, w2_ref[...],
                  preferred_element_type=jnp.float32) + b2_ref[...].astype(jnp.float32)
    o_ref[...] = (x_ref[...].astype(jnp.float32) + out).astype(o_ref.dtype)


def _pad_and_cast_params(params, C, F, C_pad, F_pad):
    dC, dF = C_pad - C, F_pad - F
    w_dw = jnp.pad(params["w_dw"], ((0, 0), (0, dC)))
    b_dw = jnp.pad(params["b_dw"], ((0, 0), (0, dC)))
    w1 = jnp.pad(params["w1"], ((0, dC), (0, dF)))
    b1 = jnp.pad(params["b1"], ((0, 0), (0, dF)))
    gamma = jnp.pad(params["grn_gamma"], ((0, 0), (0, dF)))
    beta = jnp.pad(params["grn_beta"], ((0, 0), (0, dF)))
    w2_f32 = jnp.pad(params["w2"], ((0, dF), (0, dC)))
    b2 = jnp.pad(params["b2"], ((0, 0), (0, dC)))
    b2_eff = b2 + beta @ w2_f32                    # fold GRN beta through c2 (exact, f32)
    return {
        "w_dw": w_dw.astype(jnp.float32), "b_dw": b_dw.astype(jnp.float32),
        "w1": w1.astype(jnp.bfloat16), "b1": b1.astype(jnp.float32),
        "gamma": gamma.astype(jnp.float32),
        "w2": w2_f32.astype(jnp.bfloat16), "b2_eff": b2_eff.astype(jnp.float32),
    }


def _convnext_layer_tc_impl(x_tc, params, kernel_size, eps, single_buffer_weights):
    B, T, C = x_tc.shape
    K = kernel_size
    pad = K // 2
    assert T >= pad + 1, "reflect padding requires T > kernel_size // 2"
    assert 2 * pad <= 8, "kernel_size too large for the 8-row halo layout"
    F = params["w1"].shape[1]
    C_pad = _round_up(C, 128)
    F_pad = _round_up(F, 128)
    tT, T_pad = _pick_time_tiling(T)
    nT = T_pad // tT
    assert tT > 2 * pad

    pp = _pad_and_cast_params(params, C, F, C_pad, F_pad)

    # Reflect-extend in time once (XLA side) and lane-pad the channels.  x_p doubles as the
    # pass-2 residual; the per-tile halos are 8 sublane-aligned rows each.
    left = jnp.flip(x_tc[:, 1:pad + 1, :], axis=1)                  # [x_pad, ..., x_1]
    right = jnp.flip(x_tc[:, T - 1 - pad:T - 1, :], axis=1)         # [x_{T-2}, ..., x_{T-1-pad}]
    xr = jnp.concatenate([left, x_tc, right], axis=1)               # (B, T + 2*pad, C)
    xr = jnp.pad(xr, ((0, 0), (0, T_pad - T), (0, C_pad - C)))      # (B, T_pad + 2*pad, C_pad)
    x_p = lax.slice_in_dim(xr, pad, pad + T_pad, axis=1)            # (B, T_pad, C_pad)

    halos = []
    for t in range(nT):
        lo, hi = t * tT, (t + 1) * tT
        halos.append(jnp.concatenate(
            [xr[:, lo:lo + pad, :], xr[:, hi + pad:hi + 2 * pad, :]], axis=1))
    halos = jnp.stack(halos, axis=1)                                 # (B, nT, 2*pad, C_pad)
    halos = jnp.pad(halos, ((0, 0), (0, 0), (0, 8 - 2 * pad), (0, 0)))

    x_spec = pl.BlockSpec((None, tT, C_pad), lambda b, t: (b, t, 0))
    halo_spec = pl.BlockSpec((None, None, 8, C_pad), lambda b, t: (b, t, 0, 0))
    conv_w_specs = [
        _weight_spec((K, C_pad), lambda b, t: (0, 0), single_buffer_weights),      # dw weight
        _weight_spec((1, C_pad), lambda b, t: (0, 0), single_buffer_weights),      # dw bias
        _weight_spec((C_pad, F_pad), lambda b, t: (0, 0), single_buffer_weights),  # c1 weight
        _weight_spec((1, F_pad), lambda b, t: (0, 0), single_buffer_weights),      # c1 bias
    ]
    vmem_limit = _vmem_limit_bytes()

    # ---- pass 1: h = GELU(c1(dwconv(x))) as bf16, plus GRN statistics ----
    kern1 = functools.partial(_stats_kernel, tT=tT, K=K, pad=pad, T_real=T, T_pad=T_pad)
    h_bf16, ssq = pl.pallas_call(
        kern1,
        out_shape=(jax.ShapeDtypeStruct((B, T_pad, F_pad), jnp.bfloat16),
                   jax.ShapeDtypeStruct((B, 1, F_pad), jnp.float32)),
        grid_spec=pltpu.PrefetchScalarGridSpec(
            num_scalar_prefetch=0,
            grid=(B, nT),
            in_specs=[x_spec, halo_spec] + conv_w_specs,
            out_specs=[pl.BlockSpec((None, tT, F_pad), lambda b, t: (b, t, 0)),
                       pl.BlockSpec((None, 1, F_pad), lambda b, t: (b, 0, 0))],
        ),
        compiler_params=pltpu.CompilerParams(
            dimension_semantics=("parallel", "arbitrary"),
            vmem_limit_bytes=vmem_limit),
    )(x_p, halos, pp["w_dw"], pp["b_dw"], pp["w1"], pp["b1"])

    # ---- GRN finalize (tiny, in XLA): mean over the REAL F channels only ----
    gx = jnp.sqrt(ssq)                                               # (B, 1, F_pad)
    mean_gx = jnp.sum(gx, axis=-1, keepdims=True) / jnp.float32(F)
    nx = gx / (mean_gx + jnp.float32(eps))
    scale = (1.0 + pp["gamma"][None] * nx).astype(jnp.float32)       # (B, 1, F_pad)

    # ---- pass 2: scale h, c2 (bf16 MXU), residual add ----
    out_p = pl.pallas_call(
        _apply_kernel,
        out_shape=jax.ShapeDtypeStruct((B, T_pad, C_pad), x_tc.dtype),
        grid_spec=pltpu.PrefetchScalarGridSpec(
            num_scalar_prefetch=0,
            grid=(B, nT),
            in_specs=[
                pl.BlockSpec((None, tT, F_pad), lambda b, t: (b, t, 0)),   # h (bf16)
                pl.BlockSpec((None, 1, F_pad), lambda b, t: (b, 0, 0)),    # GRN scale
                x_spec,                                                     # residual
                _weight_spec((F_pad, C_pad), lambda b, t: (0, 0), single_buffer_weights),
                _weight_spec((1, C_pad), lambda b, t: (0, 0), single_buffer_weights),
            ],
            out_specs=pl.BlockSpec((None, tT, C_pad), lambda b, t: (b, t, 0)),
        ),
        compiler_params=pltpu.CompilerParams(
            dimension_semantics=("parallel", "parallel"),
            vmem_limit_bytes=vmem_limit),
    )(h_bf16, scale, x_p, pp["w2"], pp["b2_eff"])

    return out_p[:, :T, :C]


def convnext_layer_tc(x_tc, params, kernel_size=7, eps=1e-6):
    """Time-major entry point: x_tc is (B, T, C); returns (B, T, C)."""
    try:
        return _convnext_layer_tc_impl(x_tc, params, kernel_size, eps,
                                       single_buffer_weights=True)
    except Exception:
        # pl.Buffered(1) single-buffering unsupported in this JAX build -> default buffering.
        return _convnext_layer_tc_impl(x_tc, params, kernel_size, eps,
                                       single_buffer_weights=False)


def convnext_layer(x, params, kernel_size=7, eps=1e-6):
    """x: (B, C, T) float32, PyTorch NCT layout. Returns (B, C, T)."""
    x_tc = jnp.transpose(x, (0, 2, 1))
    out_tc = convnext_layer_tc(x_tc, params, kernel_size=kernel_size, eps=eps)
    return jnp.transpose(out_tc, (0, 2, 1))


def reference(x, p, kernel_size=7, eps=1e-6):
    """Plain-JAX f32 replica of the PyTorch forward (NCT layout, exact erf GELU)."""
    K = kernel_size
    pad = K // 2
    T = x.shape[2]
    xp = jnp.pad(x, ((0, 0), (0, 0), (pad, pad)), mode="reflect")
    y = jnp.zeros_like(x)
    for k in range(K):
        y = y + xp[:, :, k:k + T] * p["w_dw"][k, :][None, :, None]
    y = y + p["b_dw"][0][None, :, None]
    h = jnp.einsum("bct,cf->bft", y, p["w1"]) + p["b1"][0][None, :, None]
    h = 0.5 * h * (1.0 + lax.erf(h * 0.7071067811865476))
    gx = jnp.sqrt(jnp.sum(h * h, axis=2, keepdims=True))
    nx = gx / (jnp.mean(gx, axis=1, keepdims=True) + eps)
    h = p["grn_gamma"][0][None, :, None] * (h * nx) + p["grn_beta"][0][None, :, None] + h
    out = jnp.einsum("bft,fc->bct", h, p["w2"]) + p["b2"][0][None, :, None]
    return x + out


def make_params(key, channels, ffn_channels, kernel_size):
    ks = jax.random.split(key, 8)
    s = 0.1
    return {
        # depthwise Conv1d weight (C, 1, K) stored as (K, C); bias (C,) stored as (1, C)
        "w_dw": s * jax.random.normal(ks[0], (kernel_size, channels), jnp.float32),
        "b_dw": s * jax.random.normal(ks[1], (1, channels), jnp.float32),
        # pointwise Conv1d C -> F: weight (F, C, 1) stored as (C, F); bias (1, F)
        "w1": s * jax.random.normal(ks[2], (channels, ffn_channels), jnp.float32),
        "b1": s * jax.random.normal(ks[3], (1, ffn_channels), jnp.float32),
        # GRN params (1, F, 1) stored as (1, F) (randomised so the GRN path is exercised)
        "grn_gamma": s * jax.random.normal(ks[4], (1, ffn_channels), jnp.float32),
        "grn_beta": s * jax.random.normal(ks[5], (1, ffn_channels), jnp.float32),
        # pointwise Conv1d F -> C: weight (C, F, 1) stored as (F, C); bias (1, C)
        "w2": s * jax.random.normal(ks[6], (ffn_channels, channels), jnp.float32),
        "b2": s * jax.random.normal(ks[7], (1, channels), jnp.float32),
    }


if __name__ == "__main__":
    B, C, T = 2, 4, 16
    FFN = 32
    K = 7

    key = jax.random.PRNGKey(0)
    kx, kp = jax.random.split(key)
    x = jax.random.normal(kx, (B, C, T), jnp.float32)
    params = make_params(kp, C, FFN, K)

    out = convnext_layer(x, params, kernel_size=K)
    out = jax.block_until_ready(out)

    ref = reference(x, params, kernel_size=K)
    assert out.shape == (B, C, T)
    # bf16 MXU operands (f32 accumulation) + tanh-GELU -> bf16-appropriate tolerance.
    err = float(jnp.max(jnp.abs(out - ref)))
    assert jnp.allclose(out, ref, rtol=1e-2, atol=1e-2), f"max abs err {err}"

    print("KERNEL_OK")
</pallas_src>

<mosaic_0001>
module attributes {stable_mosaic.version = 11 : i64} {
  func.func @_stats_kernel(%arg0: i32, %arg1: i32, %arg2: memref<1x16x128xf32, #tpu.memory_space<vmem>>, %arg3: memref<1x1x8x128xf32, #tpu.memory_space<vmem>>, %arg4: memref<7x128xf32, #tpu.memory_space<vmem>>, %arg5: memref<1x128xf32, #tpu.memory_space<vmem>>, %arg6: memref<128x128xbf16, #tpu.memory_space<vmem>>, %arg7: memref<1x128xf32, #tpu.memory_space<vmem>>, %arg8: memref<1x16x128xbf16, #tpu.memory_space<vmem>>, %arg9: memref<1x1x128xf32, #tpu.memory_space<vmem>>) attributes {dimension_semantics = [#tpu.dimension_semantics<parallel>, #tpu.dimension_semantics<arbitrary>], iteration_bounds = array<i64: 2, 1>, scalar_prefetch = 0 : i64, scratch_operands = 0 : i64, tpu.core_type = #tpu.core_type<tc>, window_params = [{transform_indices = @transform_0, window_bounds = array<i64: 1, 16, 128>}, {transform_indices = @transform_1, window_bounds = array<i64: 1, 1, 8, 128>}, {pipeline_mode = #tpu.pipeline_mode<synchronous>, transform_indices = @transform_2, window_bounds = array<i64: 7, 128>}, {pipeline_mode = #tpu.pipeline_mode<synchronous>, transform_indices = @transform_3, window_bounds = array<i64: 1, 128>}, {pipeline_mode = #tpu.pipeline_mode<synchronous>, transform_indices = @transform_4, window_bounds = array<i64: 128, 128>}, {pipeline_mode = #tpu.pipeline_mode<synchronous>, transform_indices = @transform_5, window_bounds = array<i64: 1, 128>}, {transform_indices = @transform_6, window_bounds = array<i64: 1, 16, 128>}, {transform_indices = @transform_7, window_bounds = array<i64: 1, 1, 128>}]} {
    %c0_i32 = arith.constant 0 : i32
    %0 = arith.cmpi eq, %arg1, %c0_i32 : i32
    %1 = arith.extui %0 : i1 to i32
    %c0_i32_0 = arith.constant 0 : i32
    %2 = arith.cmpi ne, %1, %c0_i32_0 : i32
    scf.if %2 {
      %cst_44 = arith.constant 0.000000e+00 : f32
      %111 = vector.broadcast %cst_44 : f32 to vector<1x128xf32>
      %c0_45 = arith.constant 0 : index
      %c0_46 = arith.constant 0 : index
      %c0_47 = arith.constant 0 : index
      %112 = vector.load %arg9[%c0_45, %c0_46, %c0_47] : memref<1x1x128xf32, #tpu.memory_space<vmem>>, vector<1x1x128xf32>
      %113 = vector.shape_cast %112 : vector<1x1x128xf32> to vector<1x128xf32>
      %114 = vector.shape_cast %111 : vector<1x128xf32> to vector<1x1x128xf32>
      tpu.vector_store %arg9[%c0_45, %c0_46, %c0_47], %114 {strides = array<i32>} : memref<1x1x128xf32, #tpu.memory_space<vmem>>, vector<1x1x128xf32>,
    } else {
    }
    %c0 = arith.constant 0 : index
    %c0_1 = arith.constant 0 : index
    %c0_2 = arith.constant 0 : index
    %3 = vector.load %arg2[%c0, %c0_1, %c0_2] : memref<1x16x128xf32, #tpu.memory_space<vmem>>, vector<1x16x128xf32>
    %4 = vector.shape_cast %3 : vector<1x16x128xf32> to vector<16x128xf32>
    %c0_3 = arith.constant 0 : index
    %c0_4 = arith.constant 0 : index
    %c0_5 = arith.constant 0 : index
    %c0_6 = arith.constant 0 : index
    %5 = vector.load %arg3[%c0_3, %c0_4, %c0_5, %c0_6] : memref<1x1x8x128xf32, #tpu.memory_space<vmem>>, vector<1x1x8x128xf32>
    %6 = vector.shape_cast %5 : vector<1x1x8x128xf32> to vector<8x128xf32>
    %cst = arith.constant 0.000000e+00 : f32
    %7 = vector.broadcast %cst : f32 to vector<8x128xf32>
    %8 = tpu.concatenate %6, %7 in 0 : vector<8x128xf32>, vector<8x128xf32> -> vector<16x128xf32>
    %c13_i32 = arith.constant 13 : i32
    %9 = tpu.dynamic_rotate %8 by %c13_i32 dim 0 : vector<16x128xf32>, i32 -> vector<16x128xf32>
    %10 = tpu.iota {dimensions = array<i32: 0>} : vector<16x1xi32>
    %cst_7 = arith.constant 0.000000e+00 : f32
    %11 = vector.broadcast %cst_7 : f32 to vector<16x128xf32>
    %c0_8 = arith.constant 0 : index
    %c0_9 = arith.constant 0 : index
    %12 = vector.load %arg5[%c0_8, %c0_9] : memref<1x128xf32, #tpu.memory_space<vmem>>, vector<1x128xf32>
    %13 = vector.broadcast %12 : vector<1x128xf32> to vector<16x128xf32>
    %14 = arith.addf %11, %13 : vector<16x128xf32>
    %c0_10 = arith.constant 0 : index
    %c0_11 = arith.constant 0 : index
    %15 = vector.load %arg4[%c0_10, %c0_11] : memref<7x128xf32, #tpu.memory_space<vmem>>, vector<1x128xf32>
    %c13_i32_12 = arith.constant 13 : i32
    %16 = vector.broadcast %c13_i32_12 : i32 to vector<16x1xi32>
    %17 = arith.cmpi sge, %10, %16 : vector<16x1xi32>
    %18 = vector.shape_cast %17 : vector<16x1xi1> to vector<16x1xi1>
    %19 = vector.broadcast %18 : vector<16x1xi1> to vector<16x128xi1>
    %20 = arith.select %19, %9, %4 : vector<16x128xi1>, vector<16x128xf32>
    %c3_i32 = arith.constant 3 : i32
    %21 = tpu.dynamic_rotate %20 by %c3_i32 dim 0 : vector<16x128xf32>, i32 -> vector<16x128xf32>
    %22 = vector.broadcast %15 : vector<1x128xf32> to vector<16x128xf32>
    %23 = arith.mulf %21, %22 : vector<16x128xf32>
    %24 = arith.addf %14, %23 : vector<16x128xf32>
    %c1 = arith.constant 1 : index
    %c0_13 = arith.constant 0 : index
    %25 = vector.load %arg4[%c1, %c0_13] : memref<7x128xf32, #tpu.memory_space<vmem>>, vector<1x128xf32>
    %c14_i32 = arith.constant 14 : i32
    %26 = vector.broadcast %c14_i32 : i32 to vector<16x1xi32>
    %27 = arith.cmpi sge, %10, %26 : vector<16x1xi32>
    %28 = vector.shape_cast %27 : vector<16x1xi1> to vector<16x1xi1>
    %29 = vector.broadcast %28 : vector<16x1xi1> to vector<16x128xi1>
    %30 = arith.select %29, %9, %4 : vector<16x128xi1>, vector<16x128xf32>
    %c2_i32 = arith.constant 2 : i32
    %31 = tpu.dynamic_rotate %30 by %c2_i32 dim 0 : vector<16x128xf32>, i32 -> vector<16x128xf32>
    %32 = vector.broadcast %25 : vector<1x128xf32> to vector<16x128xf32>
    %33 = arith.mulf %31, %32 : vector<16x128xf32>
    %34 = arith.addf %24, %33 : vector<16x128xf32>
    %c2 = arith.constant 2 : index
    %c0_14 = arith.constant 0 : index
    %35 = vector.load %arg4[%c2, %c0_14] : memref<7x128xf32, #tpu.memory_space<vmem>>, vector<1x128xf32>
    %c15_i32 = arith.constant 15 : i32
    %36 = vector.broadcast %c15_i32 : i32 to vector<16x1xi32>
    %37 = arith.cmpi sge, %10, %36 : vector<16x1xi32>
    %38 = vector.shape_cast %37 : vector<16x1xi1> to vector<16x1xi1>
    %39 = vector.broadcast %38 : vector<16x1xi1> to vector<16x128xi1>
    %40 = arith.select %39, %9, %4 : vector<16x128xi1>, vector<16x128xf32>
    %c1_i32 = arith.constant 1 : i32
    %41 = tpu.dynamic_rotate %40 by %c1_i32 dim 0 : vector<16x128xf32>, i32 -> vector<16x128xf32>
    %42 = vector.broadcast %35 : vector<1x128xf32> to vector<16x128xf32>
    %43 = arith.mulf %41, %42 : vector<16x128xf32>
    %44 = arith.addf %34, %43 : vector<16x128xf32>
    %c3 = arith.constant 3 : index
    %c0_15 = arith.constant 0 : index
    %45 = vector.load %arg4[%c3, %c0_15] : memref<7x128xf32, #tpu.memory_space<vmem>>, vector<1x128xf32>
    %46 = vector.broadcast %45 : vector<1x128xf32> to vector<16x128xf32>
    %47 = arith.mulf %4, %46 : vector<16x128xf32>
    %48 = arith.addf %44, %47 : vector<16x128xf32>
    %c4 = arith.constant 4 : index
    %c0_16 = arith.constant 0 : index
    %49 = vector.load %arg4[%c4, %c0_16] : memref<7x128xf32, #tpu.memory_space<vmem>>, vector<1x128xf32>
    %c1_i32_17 = arith.constant 1 : i32
    %50 = vector.broadcast %c1_i32_17 : i32 to vector<16x1xi32>
    %51 = arith.cmpi slt, %10, %50 : vector<16x1xi32>
    %52 = vector.shape_cast %51 : vector<16x1xi1> to vector<16x1xi1>
    %53 = vector.broadcast %52 : vector<16x1xi1> to vector<16x128xi1>
    %54 = arith.select %53, %9, %4 : vector<16x128xi1>, vector<16x128xf32>
    %c15_i32_18 = arith.constant 15 : i32
    %55 = tpu.dynamic_rotate %54 by %c15_i32_18 dim 0 : vector<16x128xf32>, i32 -> vector<16x128xf32>
    %56 = vector.broadcast %49 : vector<1x128xf32> to vector<16x128xf32>
    %57 = arith.mulf %55, %56 : vector<16x128xf32>
    %58 = arith.addf %48, %57 : vector<16x128xf32>
    %c5 = arith.constant 5 : index
    %c0_19 = arith.constant 0 : index
    %59 = vector.load %arg4[%c5, %c0_19] : memref<7x128xf32, #tpu.memory_space<vmem>>, vector<1x128xf32>
    %c2_i32_20 = arith.constant 2 : i32
    %60 = vector.broadcast %c2_i32_20 : i32 to vector<16x1xi32>
    %61 = arith.cmpi slt, %10, %60 : vector<16x1xi32>
    %62 = vector.shape_cast %61 : vector<16x1xi1> to vector<16x1xi1>
    %63 = vector.broadcast %62 : vector<16x1xi1> to vector<16x128xi1>
    %64 = arith.select %63, %9, %4 : vector<16x128xi1>, vector<16x128xf32>
    %c14_i32_21 = arith.constant 14 : i32
    %65 = tpu.dynamic_rotate %64 by %c14_i32_21 dim 0 : vector<16x128xf32>, i32 -> vector<16x128xf32>
    %66 = vector.broadcast %59 : vector<1x128xf32> to vector<16x128xf32>
    %67 = arith.mulf %65, %66 : vector<16x128xf32>
    %68 = arith.addf %58, %67 : vector<16x128xf32>
    %c6 = arith.constant 6 : index
    %c0_22 = arith.constant 0 : index
    %69 = vector.load %arg4[%c6, %c0_22] : memref<7x128xf32, #tpu.memory_space<vmem>>, vector<1x128xf32>
    %c3_i32_23 = arith.constant 3 : i32
    %70 = vector.broadcast %c3_i32_23 : i32 to vector<16x1xi32>
    %71 = arith.cmpi slt, %10, %70 : vector<16x1xi32>
    %72 = vector.shape_cast %71 : vector<16x1xi1> to vector<16x1xi1>
    %73 = vector.broadcast %72 : vector<16x1xi1> to vector<16x128xi1>
    %74 = arith.select %73, %9, %4 : vector<16x128xi1>, vector<16x128xf32>
    %c13_i32_24 = arith.constant 13 : i32
    %75 = tpu.dynamic_rotate %74 by %c13_i32_24 dim 0 : vector<16x128xf32>, i32 -> vector<16x128xf32>
    %76 = vector.broadcast %69 : vector<1x128xf32> to vector<16x128xf32>
    %77 = arith.mulf %75, %76 : vector<16x128xf32>
    %78 = arith.addf %68, %77 : vector<16x128xf32>
    %79 = arith.truncf %78 : vector<16x128xf32> to vector<16x128xbf16>
    %c0_25 = arith.constant 0 : index
    %c0_26 = arith.constant 0 : index
    %80 = vector.load %arg6[%c0_25, %c0_26] : memref<128x128xbf16, #tpu.memory_space<vmem>>, vector<128x128xbf16>
    %cst_27 = arith.constant dense<0.000000e+00> : vector<16x128xf32>
    %81 = tpu.matmul %79, %80, %cst_27 {dimension_numbers = #tpu.dot_dimension_numbers<[1], [0], [0], [1], [0, 0, 1, 1], [], []>} : vector<16x128xbf16>, vector<128x128xbf16>, vector<16x128xf32> -> vector<16x128xf32>
    %c0_28 = arith.constant 0 : index
    %c0_29 = arith.constant 0 : index
    %82 = vector.load %arg7[%c0_28, %c0_29] : memref<1x128xf32, #tpu.memory_space<vmem>>, vector<1x128xf32>
    %83 = vector.broadcast %82 : vector<1x128xf32> to vector<16x128xf32>
    %84 = arith.addf %81, %83 : vector<16x128xf32>
    %cst_30 = arith.constant 5.000000e-01 : f32
    %85 = vector.broadcast %cst_30 : f32 to vector<16x128xf32>
    %86 = arith.mulf %85, %84 : vector<16x128xf32>
    %cst_31 = arith.constant 4.471500e-02 : f32
    %87 = vector.broadcast %cst_31 : f32 to vector<16x128xf32>
    %88 = arith.mulf %87, %84 : vector<16x128xf32>
    %89 = arith.mulf %88, %84 : vector<16x128xf32>
    %90 = arith.mulf %89, %84 : vector<16x128xf32>
    %91 = arith.addf %84, %90 : vector<16x128xf32>
    %cst_32 = arith.constant 0.797884583 : f32
    %92 = vector.broadcast %cst_32 : f32 to vector<16x128xf32>
    %93 = arith.mulf %92, %91 : vector<16x128xf32>
    %94 = math.tanh %93 : vector<16x128xf32>
    %cst_33 = arith.constant 1.000000e+00 : f32
    %95 = vector.broadcast %cst_33 : f32 to vector<16x128xf32>
    %96 = arith.addf %95, %94 : vector<16x128xf32>
    %97 = arith.mulf %86, %96 : vector<16x128xf32>
    %98 = arith.truncf %97 : vector<16x128xf32> to vector<16x128xbf16>
    %c0_34 = arith.constant 0 : index
    %c0_35 = arith.constant 0 : index
    %c0_36 = arith.constant 0 : index
    %99 = vector.load %arg8[%c0_34, %c0_35, %c0_36] : memref<1x16x128xbf16, #tpu.memory_space<vmem>>, vector<1x16x128xbf16>
    %100 = vector.shape_cast %99 : vector<1x16x128xbf16> to vector<16x128xbf16>
    %101 = vector.shape_cast %98 : vector<16x128xbf16> to vector<1x16x128xbf16>
    tpu.vector_store %arg8[%c0_34, %c0_35, %c0_36], %101 {strides = array<i32>} : memref<1x16x128xbf16, #tpu.memory_space<vmem>>, vector<1x16x128xbf16>,
    %102 = arith.mulf %97, %97 : vector<16x128xf32>
    %c0_37 = arith.constant 0 : index
    %c0_38 = arith.constant 0 : index
    %c0_39 = arith.constant 0 : index
    %103 = vector.load %arg9[%c0_37, %c0_38, %c0_39] : memref<1x1x128xf32, #tpu.memory_space<vmem>>, vector<1x1x128xf32>
    %104 = vector.shape_cast %103 : vector<1x1x128xf32> to vector<1x128xf32>
    %cst_40 = arith.constant dense<0.000000e+00> : vector<128xf32>
    %105 = vector.multi_reduction <add>, %102, %cst_40 [0] : vector<16x128xf32> to vector<128xf32>
    %106 = vector.shape_cast %105 : vector<128xf32> to vector<1x128xf32>
    %107 = arith.addf %104, %106 : vector<1x128xf32>
    %c0_41 = arith.constant 0 : index
    %c0_42 = arith.constant 0 : index
    %c0_43 = arith.constant 0 : index
    %108 = vector.load %arg9[%c0_41, %c0_42, %c0_43] : memref<1x1x128xf32, #tpu.memory_space<vmem>>, vector<1x1x128xf32>
    %109 = vector.shape_cast %108 : vector<1x1x128xf32> to vector<1x128xf32>
    %110 = vector.shape_cast %107 : vector<1x128xf32> to vector<1x1x128xf32>
    tpu.vector_store %arg9[%c0_41, %c0_42, %c0_43], %110 {strides = array<i32>} : memref<1x1x128xf32, #tpu.memory_space<vmem>>, vector<1x1x128xf32>,
    return
  }
  func.func @transform_0(%arg0: i32, %arg1: i32) -> (i32, i32, i32) {
    %c0_i32 = arith.constant 0 : i32
    %c0_i32_0 = arith.constant 0 : i32
    return %arg0, %arg1, %c0_i32 : i32, i32, i32
  }
  func.func @transform_1(%arg0: i32, %arg1: i32) -> (i32, i32, i32, i32) {
    %c0_i32 = arith.constant 0 : i32
    %c0_i32_0 = arith.constant 0 : i32
    %c0_i32_1 = arith.constant 0 : i32
    return %arg0, %arg1, %c0_i32, %c0_i32_0 : i32, i32, i32, i32
  }
  func.func @transform_2(%arg0: i32, %arg1: i32) -> (i32, i32) {
    %c0_i32 = arith.constant 0 : i32
    %c0_i32_0 = arith.constant 0 : i32
    %c0_i32_1 = arith.constant 0 : i32
    return %c0_i32, %c0_i32_0 : i32, i32
  }
  func.func @transform_3(%arg0: i32, %arg1: i32) -> (i32, i32) {
    %c0_i32 = arith.constant 0 : i32
    %c0_i32_0 = arith.constant 0 : i32
    %c0_i32_1 = arith.constant 0 : i32
    return %c0_i32, %c0_i32_0 : i32, i32
  }
  func.func @transform_4(%arg0: i32, %arg1: i32) -> (i32, i32) {
    %c0_i32 = arith.constant 0 : i32
    %c0_i32_0 = arith.constant 0 : i32
    %c0_i32_1 = arith.constant 0 : i32
    return %c0_i32, %c0_i32_0 : i32, i32
  }
  func.func @transform_5(%arg0: i32, %arg1: i32) -> (i32, i32) {
    %c0_i32 = arith.constant 0 : i32
    %c0_i32_0 = arith.constant 0 : i32
    %c0_i32_1 = arith.constant 0 : i32
    return %c0_i32, %c0_i32_0 : i32, i32
  }
  func.func @transform_6(%arg0: i32, %arg1: i32) -> (i32, i32, i32) {
    %c0_i32 = arith.constant 0 : i32
    %c0_i32_0 = arith.constant 0 : i32
    return %arg0, %arg1, %c0_i32 : i32, i32, i32
  }
  func.func @transform_7(%arg0: i32, %arg1: i32) -> (i32, i32, i32) {
    %c0_i32 = arith.constant 0 : i32
    %c0_i32_0 = arith.constant 0 : i32
    %c0_i32_1 = arith.constant 0 : i32
    return %arg0, %c0_i32, %c0_i32_0 : i32, i32, i32
  }
}

module attributes {stable_mosaic.version = 11 : i64} {
  func.func @_stats_kernel(%arg0: i32, %arg1: i32, %arg2: memref<1x16x128xf32, #tpu.memory_space<vmem>>, %arg3: memref<1x1x8x128xf32, #tpu.memory_space<vmem>>, %arg4: memref<7x128xf32, #tpu.memory_space<vmem>>, %arg5: memref<1x128xf32, #tpu.memory_space<vmem>>, %arg6: memref<128x128xbf16, #tpu.memory_space<vmem>>, %arg7: memref<1x128xf32, #tpu.memory_space<vmem>>, %arg8: memref<1x16x128xbf16, #tpu.memory_space<vmem>>, %arg9: memref<1x1x128xf32, #tpu.memory_space<vmem>>) attributes {dimension_semantics = [#tpu.dimension_semantics<parallel>, #tpu.dimension_semantics<arbitrary>], iteration_bounds = array<i64: 2, 1>, scalar_prefetch = 0 : i64, scratch_operands = 0 : i64, tpu.core_type = #tpu.core_type<tc>, window_params = [{transform_indices = @transform_0, window_bounds = array<i64: 1, 16, 128>}, {transform_indices = @transform_1, window_bounds = array<i64: 1, 1, 8, 128>}, {pipeline_mode = #tpu.pipeline_mode<synchronous>, transform_indices = @transform_2, window_bounds = array<i64: 7, 128>}, {pipeline_mode = #tpu.pipeline_mode<synchronous>, transform_indices = @transform_3, window_bounds = array<i64: 1, 128>}, {pipeline_mode = #tpu.pipeline_mode<synchronous>, transform_indices = @transform_4, window_bounds = array<i64: 128, 128>}, {pipeline_mode = #tpu.pipeline_mode<synchronous>, transform_indices = @transform_5, window_bounds = array<i64: 1, 128>}, {transform_indices = @transform_6, window_bounds = array<i64: 1, 16, 128>}, {transform_indices = @transform_7, window_bounds = array<i64: 1, 1, 128>}]} {
    %c0_i32 = arith.constant 0 : i32
    %0 = arith.cmpi eq, %arg1, %c0_i32 : i32
    %1 = arith.extui %0 : i1 to i32
    %c0_i32_0 = arith.constant 0 : i32
    %2 = arith.cmpi ne, %1, %c0_i32_0 : i32
    scf.if %2 {
      %cst_44 = arith.constant 0.000000e+00 : f32
      %111 = vector.broadcast %cst_44 : f32 to vector<1x128xf32>
      %c0_45 = arith.constant 0 : index
      %c0_46 = arith.constant 0 : index
      %c0_47 = arith.constant 0 : index
      %112 = vector.load %arg9[%c0_45, %c0_46, %c0_47] : memref<1x1x128xf32, #tpu.memory_space<vmem>>, vector<1x1x128xf32>
      %113 = vector.shape_cast %112 : vector<1x1x128xf32> to vector<1x128xf32>
      %114 = vector.shape_cast %111 : vector<1x128xf32> to vector<1x1x128xf32>
      tpu.vector_store %arg9[%c0_45, %c0_46, %c0_47], %114 {strides = array<i32>} : memref<1x1x128xf32, #tpu.memory_space<vmem>>, vector<1x1x128xf32>,
    } else {
    }
    %c0 = arith.constant 0 : index
    %c0_1 = arith.constant 0 : index
    %c0_2 = arith.constant 0 : index
    %3 = vector.load %arg2[%c0, %c0_1, %c0_2] : memref<1x16x128xf32, #tpu.memory_space<vmem>>, vector<1x16x128xf32>
    %4 = vector.shape_cast %3 : vector<1x16x128xf32> to vector<16x128xf32>
    %c0_3 = arith.constant 0 : index
    %c0_4 = arith.constant 0 : index
    %c0_5 = arith.constant 0 : index
    %c0_6 = arith.constant 0 : index
    %5 = vector.load %arg3[%c0_3, %c0_4, %c0_5, %c0_6] : memref<1x1x8x128xf32, #tpu.memory_space<vmem>>, vector<1x1x8x128xf32>
    %6 = vector.shape_cast %5 : vector<1x1x8x128xf32> to vector<8x128xf32>
    %cst = arith.constant 0.000000e+00 : f32
    %7 = vector.broadcast %cst : f32 to vector<8x128xf32>
    %8 = tpu.concatenate %6, %7 in 0 : vector<8x128xf32>, vector<8x128xf32> -> vector<16x128xf32>
    %c13_i32 = arith.constant 13 : i32
    %9 = tpu.dynamic_rotate %8 by %c13_i32 dim 0 : vector<16x128xf32>, i32 -> vector<16x128xf32>
    %10 = tpu.iota {dimensions = array<i32: 0>} : vector<16x1xi32>
    %cst_7 = arith.constant 0.000000e+00 : f32
    %11 = vector.broadcast %cst_7 : f32 to vector<16x128xf32>
    %c0_8 = arith.constant 0 : index
    %c0_9 = arith.constant 0 : index
    %12 = vector.load %arg5[%c0_8, %c0_9] : memref<1x128xf32, #tpu.memory_space<vmem>>, vector<1x128xf32>
    %13 = vector.broadcast %12 : vector<1x128xf32> to vector<16x128xf32>
    %14 = arith.addf %11, %13 : vector<16x128xf32>
    %c0_10 = arith.constant 0 : index
    %c0_11 = arith.constant 0 : index
    %15 = vector.load %arg4[%c0_10, %c0_11] : memref<7x128xf32, #tpu.memory_space<vmem>>, vector<1x128xf32>
    %c13_i32_12 = arith.constant 13 : i32
    %16 = vector.broadcast %c13_i32_12 : i32 to vector<16x1xi32>
    %17 = arith.cmpi sge, %10, %16 : vector<16x1xi32>
    %18 = vector.shape_cast %17 : vector<16x1xi1> to vector<16x1xi1>
    %19 = vector.broadcast %18 : vector<16x1xi1> to vector<16x128xi1>
    %20 = arith.select %19, %9, %4 : vector<16x128xi1>, vector<16x128xf32>
    %c3_i32 = arith.constant 3 : i32
    %21 = tpu.dynamic_rotate %20 by %c3_i32 dim 0 : vector<16x128xf32>, i32 -> vector<16x128xf32>
    %22 = vector.broadcast %15 : vector<1x128xf32> to vector<16x128xf32>
    %23 = arith.mulf %21, %22 : vector<16x128xf32>
    %24 = arith.addf %14, %23 : vector<16x128xf32>
    %c1 = arith.constant 1 : index
    %c0_13 = arith.constant 0 : index
    %25 = vector.load %arg4[%c1, %c0_13] : memref<7x128xf32, #tpu.memory_space<vmem>>, vector<1x128xf32>
    %c14_i32 = arith.constant 14 : i32
    %26 = vector.broadcast %c14_i32 : i32 to vector<16x1xi32>
    %27 = arith.cmpi sge, %10, %26 : vector<16x1xi32>
    %28 = vector.shape_cast %27 : vector<16x1xi1> to vector<16x1xi1>
    %29 = vector.broadcast %28 : vector<16x1xi1> to vector<16x128xi1>
    %30 = arith.select %29, %9, %4 : vector<16x128xi1>, vector<16x128xf32>
    %c2_i32 = arith.constant 2 : i32
    %31 = tpu.dynamic_rotate %30 by %c2_i32 dim 0 : vector<16x128xf32>, i32 -> vector<16x128xf32>
    %32 = vector.broadcast %25 : vector<1x128xf32> to vector<16x128xf32>
    %33 = arith.mulf %31, %32 : vector<16x128xf32>
    %34 = arith.addf %24, %33 : vector<16x128xf32>
    %c2 = arith.constant 2 : index
    %c0_14 = arith.constant 0 : index
    %35 = vector.load %arg4[%c2, %c0_14] : memref<7x128xf32, #tpu.memory_space<vmem>>, vector<1x128xf32>
    %c15_i32 = arith.constant 15 : i32
    %36 = vector.broadcast %c15_i32 : i32 to vector<16x1xi32>
    %37 = arith.cmpi sge, %10, %36 : vector<16x1xi32>
    %38 = vector.shape_cast %37 : vector<16x1xi1> to vector<16x1xi1>
    %39 = vector.broadcast %38 : vector<16x1xi1> to vector<16x128xi1>
    %40 = arith.select %39, %9, %4 : vector<16x128xi1>, vector<16x128xf32>
    %c1_i32 = arith.constant 1 : i32
    %41 = tpu.dynamic_rotate %40 by %c1_i32 dim 0 : vector<16x128xf32>, i32 -> vector<16x128xf32>
    %42 = vector.broadcast %35 : vector<1x128xf32> to vector<16x128xf32>
    %43 = arith.mulf %41, %42 : vector<16x128xf32>
    %44 = arith.addf %34, %43 : vector<16x128xf32>
    %c3 = arith.constant 3 : index
    %c0_15 = arith.constant 0 : index
    %45 = vector.load %arg4[%c3, %c0_15] : memref<7x128xf32, #tpu.memory_space<vmem>>, vector<1x128xf32>
    %46 = vector.broadcast %45 : vector<1x128xf32> to vector<16x128xf32>
    %47 = arith.mulf %4, %46 : vector<16x128xf32>
    %48 = arith.addf %44, %47 : vector<16x128xf32>
    %c4 = arith.constant 4 : index
    %c0_16 = arith.constant 0 : index
    %49 = vector.load %arg4[%c4, %c0_16] : memref<7x128xf32, #tpu.memory_space<vmem>>, vector<1x128xf32>
    %c1_i32_17 = arith.constant 1 : i32
    %50 = vector.broadcast %c1_i32_17 : i32 to vector<16x1xi32>
    %51 = arith.cmpi slt, %10, %50 : vector<16x1xi32>
    %52 = vector.shape_cast %51 : vector<16x1xi1> to vector<16x1xi1>
    %53 = vector.broadcast %52 : vector<16x1xi1> to vector<16x128xi1>
    %54 = arith.select %53, %9, %4 : vector<16x128xi1>, vector<16x128xf32>
    %c15_i32_18 = arith.constant 15 : i32
    %55 = tpu.dynamic_rotate %54 by %c15_i32_18 dim 0 : vector<16x128xf32>, i32 -> vector<16x128xf32>
    %56 = vector.broadcast %49 : vector<1x128xf32> to vector<16x128xf32>
    %57 = arith.mulf %55, %56 : vector<16x128xf32>
    %58 = arith.addf %48, %57 : vector<16x128xf32>
    %c5 = arith.constant 5 : index
    %c0_19 = arith.constant 0 : index
    %59 = vector.load %arg4[%c5, %c0_19] : memref<7x128xf32, #tpu.memory_space<vmem>>, vector<1x128xf32>
    %c2_i32_20 = arith.constant 2 : i32
    %60 = vector.broadcast %c2_i32_20 : i32 to vector<16x1xi32>
    %61 = arith.cmpi slt, %10, %60 : vector<16x1xi32>
    %62 = vector.shape_cast %61 : vector<16x1xi1> to vector<16x1xi1>
    %63 = vector.broadcast %62 : vector<16x1xi1> to vector<16x128xi1>
    %64 = arith.select %63, %9, %4 : vector<16x128xi1>, vector<16x128xf32>
    %c14_i32_21 = arith.constant 14 : i32
    %65 = tpu.dynamic_rotate %64 by %c14_i32_21 dim 0 : vector<16x128xf32>, i32 -> vector<16x128xf32>
    %66 = vector.broadcast %59 : vector<1x128xf32> to vector<16x128xf32>
    %67 = arith.mulf %65, %66 : vector<16x128xf32>
    %68 = arith.addf %58, %67 : vector<16x128xf32>
    %c6 = arith.constant 6 : index
    %c0_22 = arith.constant 0 : index
    %69 = vector.load %arg4[%c6, %c0_22] : memref<7x128xf32, #tpu.memory_space<vmem>>, vector<1x128xf32>
    %c3_i32_23 = arith.constant 3 : i32
    %70 = vector.broadcast %c3_i32_23 : i32 to vector<16x1xi32>
    %71 = arith.cmpi slt, %10, %70 : vector<16x1xi32>
    %72 = vector.shape_cast %71 : vector<16x1xi1> to vector<16x1xi1>
    %73 = vector.broadcast %72 : vector<16x1xi1> to vector<16x128xi1>
    %74 = arith.select %73, %9, %4 : vector<16x128xi1>, vector<16x128xf32>
    %c13_i32_24 = arith.constant 13 : i32
    %75 = tpu.dynamic_rotate %74 by %c13_i32_24 dim 0 : vector<16x128xf32>, i32 -> vector<16x128xf32>
    %76 = vector.broadcast %69 : vector<1x128xf32> to vector<16x128xf32>
    %77 = arith.mulf %75, %76 : vector<16x128xf32>
    %78 = arith.addf %68, %77 : vector<16x128xf32>
    %79 = arith.truncf %78 : vector<16x128xf32> to vector<16x128xbf16>
    %c0_25 = arith.constant 0 : index
    %c0_26 = arith.constant 0 : index
    %80 = vector.load %arg6[%c0_25, %c0_26] : memref<128x128xbf16, #tpu.memory_space<vmem>>, vector<128x128xbf16>
    %cst_27 = arith.constant dense<0.000000e+00> : vector<16x128xf32>
    %81 = tpu.matmul %79, %80, %cst_27 {dimension_numbers = #tpu.dot_dimension_numbers<[1], [0], [0], [1], [0, 0, 1, 1], [], []>} : vector<16x128xbf16>, vector<128x128xbf16>, vector<16x128xf32> -> vector<16x128xf32>
    %c0_28 = arith.constant 0 : index
    %c0_29 = arith.constant 0 : index
    %82 = vector.load %arg7[%c0_28, %c0_29] : memref<1x128xf32, #tpu.memory_space<vmem>>, vector<1x128xf32>
    %83 = vector.broadcast %82 : vector<1x128xf32> to vector<16x128xf32>
    %84 = arith.addf %81, %83 : vector<16x128xf32>
    %cst_30 = arith.constant 5.000000e-01 : f32
    %85 = vector.broadcast %cst_30 : f32 to vector<16x128xf32>
    %86 = arith.mulf %85, %84 : vector<16x128xf32>
    %cst_31 = arith.constant 4.471500e-02 : f32
    %87 = vector.broadcast %cst_31 : f32 to vector<16x128xf32>
    %88 = arith.mulf %87, %84 : vector<16x128xf32>
    %89 = arith.mulf %88, %84 : vector<16x128xf32>
    %90 = arith.mulf %89, %84 : vector<16x128xf32>
    %91 = arith.addf %84, %90 : vector<16x128xf32>
    %cst_32 = arith.constant 0.797884583 : f32
    %92 = vector.broadcast %cst_32 : f32 to vector<16x128xf32>
    %93 = arith.mulf %92, %91 : vector<16x128xf32>
    %94 = math.tanh %93 : vector<16x128xf32>
    %cst_33 = arith.constant 1.000000e+00 : f32
    %95 = vector.broadcast %cst_33 : f32 to vector<16x128xf32>
    %96 = arith.addf %95, %94 : vector<16x128xf32>
    %97 = arith.mulf %86, %96 : vector<16x128xf32>
    %98 = arith.truncf %97 : vector<16x128xf32> to vector<16x128xbf16>
    %c0_34 = arith.constant 0 : index
    %c0_35 = arith.constant 0 : index
    %c0_36 = arith.constant 0 : index
    %99 = vector.load %arg8[%c0_34, %c0_35, %c0_36] : memref<1x16x128xbf16, #tpu.memory_space<vmem>>, vector<1x16x128xbf16>
    %100 = vector.shape_cast %99 : vector<1x16x128xbf16> to vector<16x128xbf16>
    %101 = vector.shape_cast %98 : vector<16x128xbf16> to vector<1x16x128xbf16>
    tpu.vector_store %arg8[%c0_34, %c0_35, %c0_36], %101 {strides = array<i32>} : memref<1x16x128xbf16, #tpu.memory_space<vmem>>, vector<1x16x128xbf16>,
    %102 = arith.mulf %97, %97 : vector<16x128xf32>
    %c0_37 = arith.constant 0 : index
    %c0_38 = arith.constant 0 : index
    %c0_39 = arith.constant 0 : index
    %103 = vector.load %arg9[%c0_37, %c0_38, %c0_39] : memref<1x1x128xf32, #tpu.memory_space<vmem>>, vector<1x1x128xf32>
    %104 = vector.shape_cast %103 : vector<1x1x128xf32> to vector<1x128xf32>
    %cst_40 = arith.constant dense<0.000000e+00> : vector<128xf32>
    %105 = vector.multi_reduction <add>, %102, %cst_40 [0] : vector<16x128xf32> to vector<128xf32>
    %106 = vector.shape_cast %105 : vector<128xf32> to vector<1x128xf32>
    %107 = arith.addf %104, %106 : vector<1x128xf32>
    %c0_41 = arith.constant 0 : index
    %c0_42 = arith.constant 0 : index
    %c0_43 = arith.constant 0 : index
    %108 = vector.load %arg9[%c0_41, %c0_42, %c0_43] : memref<1x1x128xf32, #tpu.memory_space<vmem>>, vector<1x1x128xf32>
    %109 = vector.shape_cast %108 : vector<1x1x128xf32> to vector<1x128xf32>
    %110 = vector.shape_cast %107 : vector<1x128xf32> to vector<1x1x128xf32>
    tpu.vector_store %arg9[%c0_41, %c0_42, %c0_43], %110 {strides = array<i32>} : memref<1x1x128xf32, #tpu.memory_space<vmem>>, vector<1x1x128xf32>,
    return
  }
  func.func @transform_0(%arg0: i32, %arg1: i32) -> (i32, i32, i32) {
    %c0_i32 = arith.constant 0 : i32
    %c0_i32_0 = arith.constant 0 : i32
    return %arg0, %arg1, %c0_i32 : i32, i32, i32
  }
  func.func @transform_1(%arg0: i32, %arg1: i32) -> (i32, i32, i32, i32) {
    %c0_i32 = arith.constant 0 : i32
    %c0_i32_0 = arith.constant 0 : i32
    %c0_i32_1 = arith.constant 0 : i32
    return %arg0, %arg1, %c0_i32, %c0_i32_0 : i32, i32, i32, i32
  }
  func.func @transform_2(%arg0: i32, %arg1: i32) -> (i32, i32) {
    %c0_i32 = arith.constant 0 : i32
    %c0_i32_0 = arith.constant 0 : i32
    %c0_i32_1 = arith.constant 0 : i32
    return %c0_i32, %c0_i32_0 : i32, i32
  }
  func.func @transform_3(%arg0: i32, %arg1: i32) -> (i32, i32) {
    %c0_i32 = arith.constant 0 : i32
    %c0_i32_0 = arith.constant 0 : i32
    %c0_i32_1 = arith.constant 0 : i32
    return %c0_i32, %c0_i32_0 : i32, i32
  }
  func.func @transform_4(%arg0: i32, %arg1: i32) -> (i32, i32) {
    %c0_i32 = arith.constant 0 : i32
    %c0_i32_0 = arith.constant 0 : i32
    %c0_i32_1 = arith.constant 0 : i32
    return %c0_i32, %c0_i32_0 : i32, i32
  }
  func.func @transform_5(%arg0: i32, %arg1: i32) -> (i32, i32) {
    %c0_i32 = arith.constant 0 : i32
    %c0_i32_0 = arith.constant 0 : i32
    %c0_i32_1 = arith.constant 0 : i32
    return %c0_i32, %c0_i32_0 : i32, i32
  }
  func.func @transform_6(%arg0: i32, %arg1: i32) -> (i32, i32, i32) {
    %c0_i32 = arith.constant 0 : i32
    %c0_i32_0 = arith.constant 0 : i32
    return %arg0, %arg1, %c0_i32 : i32, i32, i32
  }
  func.func @transform_7(%arg0: i32, %arg1: i32) -> (i32, i32, i32) {
    %c0_i32 = arith.constant 0 : i32
    %c0_i32_0 = arith.constant 0 : i32
    %c0_i32_1 = arith.constant 0 : i32
    return %arg0, %c0_i32, %c0_i32_0 : i32, i32, i32
  }
}

</mosaic_0001>

<bundles_post_ra>
// kernel: tpu_custom_call.1
= control target key start
LH: loop header
LB: loop body
LE: loop exit
PB: predicated region body
PF: predicated region fallthrough
CT: control target
= control target key end

     0   :  { %s1705_s0 = inlined_call_operand.hbm [shape: f32[2,16,128], index: 0, kind: input, shape index: {}]   ;;  %s1706_s1 = inlined_call_operand.hbm [shape: f32[2,1,8,128], index: 1, kind: input, shape index: {}]   ;;  %s1707_s2 = inlined_call_operand.hbm [shape: f32[7,128], index: 2, kind: input, shape index: {}]   ;;  %s1708_s3 = inlined_call_operand.vmem [shape: f32[1,128], index: 3, kind: input, shape index: {}]   ;;  %s1709_s4 = inlined_call_operand.hbm [shape: bf16[128,128], index: 4, kind: input, shape index: {}]   ;;  %s1710_s5 = inlined_call_operand.vmem [shape: f32[1,128], index: 5, kind: input, shape index: {}]   ;;  %s1711_s6 = inlined_call_operand.hbm [shape: bf16[2,16,128], index: 6, kind: output, shape index: {0}]   ;;  %s1712_s7 = inlined_call_operand.hbm [shape: f32[2,1,128], index: 7, kind: output, shape index: {1}]  }
   0x1   :  { %1725 = sst [smem:[#allocation23_spill]] %s1705_s0 }
   0x2   :  { %1726 = sst [smem:[#allocation24_spill]] %s1707_s2 }
   0x3   :  { %1727 = sst [smem:[#allocation25_spill]] %s1709_s4 }
   0x4   :  { %1728 = sst [smem:[#allocation26_spill]] %s1711_s6 }
   0x5   :  { %1729 = sst [smem:[#allocation27_spill]] %s1712_s7 }
   0x6   :  { %13 = vsyncpa [#allocation3], 0 }
   0x7   :  { %15 = vsyncpa [#allocation3 + $0x1], 0 }
   0x8   :  { %16 = vsyncpa [#allocation6], 0 }
   0x9   :  { %18 = vsyncpa [#allocation6 + $0x1], 0 }
   0xa   :  { %19 = vsyncpa [#allocation9], 0 }
   0xb   :  { %20 = vsyncpa [#allocation4], 0 }
   0xc   :  { %22 = vsyncpa [#allocation4 + $0x1], 0 }
   0xd   :  { %23 = vsyncpa [#allocation12], 0 }
   0xe   :  { %25 = vsyncpa [#allocation12 + $0x1], 0  ;;  %s1378_s24 = smov 0   ;;  %s1380_s25 = smov 0  }
   0xf   :  { %s1382_s26 = smov 0   ;;  %s1384_s27 = smov 0  }
  0x10   :  { %s1386_s28 = smov 0   ;;  %s1388_s29 = smov 0  }
  0x11 LB: > { %1730 = sst [smem:[#allocation19_spill]] %s1302_s24  ;;  %s1409_s30 = sadd.s32 4294967295, %s1322_s29   ;;  %s1322_s29 = sphi %s1388_s29, %s31_s29   ;;  %s1318_s28 = sphi %s1386_s28, %s1766_s28   ;;  %s1314_s27 = sphi %s1384_s27, %s1765_s27   ;;  %s1310_s26 = sphi %s1382_s26, %s1764_s26   ;;  %s1306_s25 = sphi %s1380_s25, %s1763_s25   ;;  %s1302_s24 = sphi %s1378_s24, %s1762_s24  }
  0x12   : > { %s900_s8 = sadd.s32 4294967294, %s1322_s29   ;;  %p59_p0 = scmp.ne.s32.totalorder %s1310_s26, %s1306_s25 }
  0x13   : > { %p60_p1 = scmp.eq.s32.totalorder %s1322_s29, 0  ;;  %p65_p2 = scmp.ne.s32.totalorder %s1306_s25, %s1302_s24 }
  0x14   : > { %p1714_p3 = scmp.eq.s32.totalorder %s1409_s30, 0  ;;  %p203_p4 = scmp.eq.s32.totalorder %s1409_s30, 1 }
  0x15   : > { %p1420_p5 = por %p60_p1, %p59_p0  ;;  %p209_p6 = scmp.eq.s32.totalorder %s900_s8, 1 }
  0x16   : > { %p1426_p7 = por %p1714_p3, %p65_p2  ;;  %p1430_p8 = por %p203_p4, %p59_p0 }
  0x17   : > { %p1434_p9 = por %p209_p6, %p65_p2  ;;  %p901_p10 = scmp.ge.s32.totalorder %s1322_s29, 1 }
  0x18   : > { %s1732_s11 = scalar_select %p1426_p7, 1, 0 }
  0x19   : > { %s1733_s12 = scalar_select %p1430_p8, 1, 0 }
  0x1a   : > { %s1735_s13 = scalar_select %p1434_p9, 1, 0 }
  0x1b   : > { %1734 = sst [smem:[#allocation20_spill]] %s1733_s12  ;;  %p242_p11 = scmp.lt.s32.totalorder %s1322_s29, 3 }
  0x1c   : > { %1736 = sst [smem:[#allocation21_spill]] %s1735_s13  ;;  %s1324_s15 = smov [#allocation7]  }
  0x1d   : > { %p1441_p13 = pnand %p901_p10, %p242_p11  ;;  %s255_s16 = sshll.u32 %s1324_s15, 4  ;;  %s256_s16 = int_to_ptr.vmem [resolvable:$true] %s255_s16 }
  0x1e   : > { %p1018_p1 = scmp.lt.s32.totalorder %s1322_s29, 2  ;;  %s1325_s18 = smov [#allocation8]  }
  0x1f   : > { %s1737_s14 = scalar_select %p1441_p13, 1, 0 }
  0x20   : > { %p995_p0 = pneg %p1441_p13  ;;  %p1450_p4 = pnand %p1018_p1, %p1420_p5 }
  0x21   : > { %s268_s19 = sshll.u32 %s1325_s18, 4  ;;  %s1103_s21 = scalar_lea.vmem %s256_s16, 128  ;;  %s269_s19 = int_to_ptr.vmem [resolvable:$true] %s268_s19 }
  0x22   : > { %s1738_s17 = scalar_select %p1450_p4, 1, 0 }
  0x23   : > { %p1456_p2 = pnand %p995_p0, %p1714_p3  ;;  %p1104_p10 = scmp.ne.s32.totalorder %s256_s16, %s1103_s21 }
  0x24   : > { %p1111_p1 = scmp.lt.s32.totalorder %s256_s16, %s256_s16  ;;  %p1112_p12 = scmp.lt.s32.totalorder %s1103_s21, %s1103_s21 }
  0x25   : > { %p1094_p6 = pneg %p1456_p2 }
  0x26   : > { %p1113_p9 = por %p1112_p12, %p1111_p1 }
  0x27   : > { %p1106_p5 = pnand %p1104_p10, %p1094_p6 }
  0x29   : > { %p1107_p11 = pneg %p1106_p5 }
  0x2b   : > { %p1114_p8 = pnand %p1113_p9, %p1107_p11 }
  0x2d   : > { %1117 = shalt.err (!%p1114_p8)
}
  0x2e   : > { %s1740_s2 = sld [smem:[#allocation24_spill]]  ;;  %s1129_s8 = scalar_lea.vmem %s269_s19, 1024 }
  0x2f   : > { %p1130_p0 = scmp.ne.s32.totalorder %s269_s19, %s1129_s8  ;;  %p1137_p10 = scmp.lt.s32.totalorder %s269_s19, %s269_s19 }
  0x30   : > { %p1138_p5 = scmp.lt.s32.totalorder %s1129_s8, %s1129_s8 }
  0x31   : > { %p1132_p3 = pnand %p1130_p0, %p1094_p6 }
  0x32   : > { %p1139_p13 = por %p1138_p5, %p1137_p10 }
  0x33   : > { %p1133_p7 = pneg %p1132_p3 }
  0x34   : > { %998 = dma.hbm_to_vmem [thread:$0]  (!%p1456_p2), %s1740_s2, 128, %s256_s16, [#allocation6]  }
  0x35   : > { %p1140_p4 = pnand %p1139_p13, %p1133_p7 }
  0x37   : > { %1143 = shalt.err (!%p1140_p4)
}
  0x38   : > { %s1326_s10 = smov 64   ;;  %s1327_s15 = smov 4  }
  0x39   : > { %s1741_s4 = sld [smem:[#allocation25_spill]]  ;;  %s1479_s21 = sand.u32 1, %s1310_s26  }
  0x3a   : > { %s43_s22 = sadd.s32 1, %s1318_s28  ;;  %s905_s23 = sshll.u32 %s1479_s21, 4 }
  0x3b   : > { %p45_p3 = scmp.ge.s32.totalorder %s43_s22, 2  ;;  %s941_s8 = sshll.u32 %s1318_s28, 8 }
  0x3c   : > { %s289_s9 = scalar_lea.vmem [#allocation2], %s905_s23  ;;  %s1743_s0 = sld [smem:[#allocation23_spill]] }
  0x3d   : > { %s298_s2 = sshll.u32 %s289_s9, 4  ;;  %s1768_s22 = smov (%p45_p3, %s43_s22), 0  ;;  %s299_s2 = int_to_ptr.vmem [resolvable:$true] %s298_s2 }
  0x3e   : > { %1742 = sst [smem:[#allocation22_spill]] %s1768_s22  ;;  %p1745_p8 = scmp.ne.s32.totalorder %s1738_s17, 0 }
  0x3f   : > { %1001 = dma.hbm_to_vmem [thread:$0]  (!%p1456_p2), %s1741_s4, 1024, %s269_s19, [#allocation9], %s1326_s10, %s1326_s10, %s1327_s15  }
  0x40   : > { %s47_s19 = ssub.s32 %s1318_s28, %s1768_s22  ;;  %s286_s15 = scalar_lea.sflag [#allocation3], %s1479_s21 }
  0x41   : > { %p1491_p7 = scmp.eq.s32.totalorder %s47_s19, 0  ;;  %p1146_p9 = pneg %p1745_p8 }
  0x42   : > { %s297_s20 = scalar_lea.hbm %s1743_s0, %s941_s8  ;;  %s1157_s16 = scalar_lea.vmem %s299_s2, 256 }
  0x43   : > { %p1158_p12 = scmp.ne.s32.totalorder %s299_s2, %s1157_s16  ;;  %s1328_s9 = smov [#allocation2]  }
  0x44   : > { %s1162_s18 = sshll.u32 %s1328_s9, 4  ;;  %s1163_s18 = int_to_ptr.vmem [resolvable:$false] %s1162_s18 }
  0x45   : > { %p1160_p13 = pnand %p1158_p12, %p1146_p9  ;;  %s1164_s24 = scalar_lea.vmem %s1163_s18, 512 }
  0x46   : > { %p1165_p2 = scmp.lt.s32.totalorder %s299_s2, %s1163_s18  ;;  %p1166_p6 = scmp.lt.s32.totalorder %s1164_s24, %s1157_s16 }
  0x47   : > { %p1161_p4 = pneg %p1160_p13 }
  0x48   : > { %p1167_p11 = por %p1166_p6, %p1165_p2 }
  0x4a   : > { %p1168_p1 = pnand %p1167_p11, %p1161_p4 }
  0x4c   : > { %1171 = shalt.err (!%p1168_p1)
}
  0x4d   : > { %s1329_s13 = smov 128   ;;  %s1330_s23 = smov 8  }
  0x4e   : > { %1005 = dma.hbm_to_vmem [thread:$0]  (!%p1745_p8), %s297_s20, 256, %s299_s2, %s286_s15, %s1329_s13, %s1329_s13, %s1330_s23  }
  0x4f   : > { %s1746_s8 = sadd.s32 1, %s1310_s26  ;;  %s308_s16 = sand.u32 1, %s1322_s29  }
  0x50   : > { %s1508_s19 = scalar_select %p1491_p7, %s1310_s26, %s1746_s8  }
  0x51   : > { %s908_s9 = sshll.u32 %s1479_s21, 3  ;;  %s909_s18 = sshll.u32 %s1318_s28, 7 }
  0x52   : > { %s312_s24 = scalar_lea.vmem [#allocation5], %s908_s9  ;;  %s318_s7 = scalar_lea.hbm %s1706_s1, %s909_s18 }
  0x53   : > { %s320_s0 = sshll.u32 %s312_s24, 4  ;;  %s309_s6 = scalar_lea.sflag [#allocation6], %s308_s16  ;;  %s321_s0 = int_to_ptr.vmem [resolvable:$true] %s320_s0 }
  0x54   : > { %s1185_s12 = scalar_lea.vmem %s321_s0, 128  ;;  %s1331_s2 = smov [#allocation5]  }
  0x55   : > { %p1186_p0 = scmp.ne.s32.totalorder %s321_s0, %s1185_s12  ;;  %s1190_s20 = sshll.u32 %s1331_s2, 4  ;;  %s1191_s20 = int_to_ptr.vmem [resolvable:$false] %s1190_s20 }
  0x56   : > { %s1192_s10 = scalar_lea.vmem %s1191_s20, 256  ;;  %p1193_p3 = scmp.lt.s32.totalorder %s321_s0, %s1191_s20 }
  0x57   : > { %p1188_p10 = pnand %p1186_p0, %p1146_p9  ;;  %p1194_p7 = scmp.lt.s32.totalorder %s1192_s10, %s1185_s12 }
  0x59   : > { %p1189_p5 = pneg %p1188_p10  ;;  %p1195_p12 = por %p1194_p7, %p1193_p3 }
  0x5b   : > { %p1196_p13 = pnand %p1195_p12, %p1189_p5 }
  0x5d   : > { %1199 = shalt.err (!%p1196_p13)
}
  0x5e   : > { %1008 = dma.hbm_to_vmem [thread:$0]  (!%p1745_p8), %s318_s7, 128, %s321_s0, %s309_s6  }
  0x5f   : > { %p1747_p4 = scmp.ne.s32.totalorder %s1737_s14, 0 }
  0x60   : > { %s1524_s4 = sand.u32 (!%p1747_p4), 1, %s1306_s25   ;;  %p1748_p9 = scmp.ne.s32.totalorder (!%p1747_p4), %s1732_s11, 0 }
  0x61   : > { %329 = sbr.rel (%p1747_p4) target bundleno = 414 (0x19e), region = 44  ;;  %s911_s21 = sshll.u32 (!%p1747_p4), %s1524_s4, 4 }
  0x62   : > { %s332_s22 = scalar_lea.sflag (!%p1747_p4), [#allocation3], %s1524_s4  ;;  %s335_s15 = scalar_lea.vmem (!%p1747_p4), [#allocation2], %s911_s21 }
  0x66   : > { %1277 = dma.done.wait (%p1748_p9), %s332_s22, 256  }
  0x67   : > { %1279 = vsyncadd (%p1748_p9), %s332_s22, 4294967040  ;;  %s340_s0 = sand.u32 1, %s1409_s30   ;;  %s912_s6 = sshll.u32 %s1524_s4, 3 }
  0x68   : > { %s341_s7 = scalar_lea.sflag [#allocation6], %s340_s0  ;;  %s344_s12 = scalar_lea.vmem [#allocation5], %s912_s6 }
  0x69   : > { %1281 = dma.done.wait (%p1748_p9), %s341_s7, 128  }
  0x6a   : > { %1283 = vsyncadd (%p1748_p9), %s341_s7, 4294967168  ;;  %p1749_p8 = scmp.eq.s32.totalorder %s1409_s30, 0 }
  0x6c   : > { %1285 = dma.done.wait (%p1749_p8), [#allocation6], 128   ;;  %p1750_p2 = pmov %p1749_p8 }
  0x6e   : > { %1287 = vsyncadd (%p1750_p2), [#allocation6], 4294967168  ;;  %p1751_p6 = pmov %p1750_p2 }
  0x6f   : > { %p1752_p11 = pmov %p1750_p2 }
  0x70   : > { %1289 = dma.done.wait (%p1751_p6), [#allocation9], 1024  }
  0x71   : > { %1291 = vsyncadd (%p1752_p11), [#allocation9], 4294966272  ;;  %v1332_v0 = vmov 0.0   ;;  %vm1333_vm0 = vmmov 0   ;;  %v404_v1 = vlaneseq  ;;  %v1080_v2 = vld [vmem:[#allocation8 + $0x38] sm:$0xff]   ;;  %v1081_v4 = vld [vmem:[#allocation8 + $0x30] sm:$0xff]  }
  0x72   : > { %959 = vmatprep.subr.bf16.mxu0 %v1332_v0  ;;  %975 = vmatprep.mubr.msk.bf16.mxu0 %vm1333_vm0, %v1332_v0  ;;  %v1082_v6 = vld [vmem:[#allocation8 + $0x28] sm:$0xff]   ;;  %v1558_v9 = vld [vmem:[%s335_s15 + $0x8] sm:$0xff]  ;;  %v917_v16 = vld [vmem:[#allocation7] ss:$0 sm:$0xff]  ;;  %s1622_s14 = scalar_lea.vmem [#allocation11], %s1524_s4  ;;  %s1753_s23 = sld [smem:[#allocation20_spill]] }
  0x73   : > { %v1550_v3 = vshrl.u32 %v404_v1, 7  ;;  %960 = vmatpush3.bf16.msra.mxu0 %v1080_v2  ;;  %v1555_v7 = vld [vmem:[%s335_s15] sm:$0xff]  ;;  %v1083_v11 = vld [vmem:[#allocation8 + $0x20] sm:$0xff]   ;;  %v502_v27 = vrot.slane %v1558_v9, 1  ;;  %v523_v29 = vrot.slane %v1558_v9, 2  ;;  %v1085_v45 = vld [vmem:[#allocation8 + $0x10] sm:$0xff]  }
  0x74   : > { %961 = vmatprep.subr.bf16.mxu0 %v1332_v0  ;;  %v402_v8 = vld [vmem:[%s344_s12] sm:$0xff]  ;;  %v427_v14 = vrot.slane %v1555_v7, 5  ;;  %v449_v15 = vrot.slane %v1555_v7, 6  ;;  %v918_v21 = vld [vmem:[#allocation7 + $0x1] ss:$0 sm:$0xff]  ;;  %v471_v23 = vrot.slane %v1555_v7, 7 }
  0x75   : > { %v409_v5 = vadd.s32 8, %v1550_v3  ;;  %vm406_vm1 = vcmp.lt.s32.totalorder %v1550_v3, 5  ;;  %v403_v10 = vrot.slane %v402_v8, 3  ;;  %vm429_vm5 = vcmp.lt.s32.totalorder %v1550_v3, 3  ;;  %v1084_v25 = vld [vmem:[#allocation8 + $0x18] sm:$0xff]   ;;  %v1086_v63 = vld [vmem:[#allocation8 + $0x8] sm:$0xff]  }
  0x76   : > { %vm451_vm6 = vcmp.lt.s32.totalorder %v1550_v3, 2  ;;  %vm473_vm7 = vcmp.lt.s32.totalorder %v1550_v3, 1  ;;  %vm503_vm8 = vcmp.lt.s32.totalorder %v1550_v3, 7  ;;  %vm524_vm9 = vcmp.lt.s32.totalorder %v1550_v3, 6  ;;  %v916_v30 = vld [vmem:[%s1708_s3] ss:$0 sm:$0xff] }
  0x77   : > { %962 = vmatpush3.bf16.msra.mxu0 %v1081_v4  ;;  %vm420_vm2 = vcmp.ge.s32.totalorder %v409_v5, 13  ;;  %vm442_vm3 = vcmp.ge.s32.totalorder %v409_v5, 14  ;;  %vm464_vm4 = vcmp.ge.s32.totalorder %v409_v5, 15  ;;  %v407_v12 = vsel %vm406_vm1, %v403_v10, 0.0  ;;  %v919_v35 = vld [vmem:[#allocation7 + $0x2] ss:$0 sm:$0xff] }
  0x78   : > { %963 = vmatprep.subr.bf16.mxu0 %v1332_v0  ;;  %v408_v13 = vsel %vm406_vm1, 0.0, %v403_v10  ;;  %v499_v26 = vsel %vm473_vm7, %v407_v12, %v1555_v7  ;;  %v520_v28 = vsel %vm451_vm6, %v407_v12, %v1555_v7  ;;  %v920_v40 = vld [vmem:[#allocation7 + $0x3] ss:$0 sm:$0xff]  ;;  %v921_v50 = vld [vmem:[#allocation7 + $0x4] ss:$0 sm:$0xff]  ;;  %v541_v61 = vsel %vm429_vm5, %v407_v12, %v1555_v7  ;;  %399 = vst [vmem:[%s1622_s14] sm:$0x1] %v1332_v0 }
  0x79   : > { %v426_v17 = vsel %vm420_vm2, %v408_v13, %v1558_v9  ;;  %v448_v18 = vsel %vm442_vm3, %v408_v13, %v1558_v9  ;;  %v470_v19 = vsel %vm464_vm4, %v408_v13, %v1558_v9  ;;  %v501_v43 = vrot.slane %v499_v26, 1  ;;  %v922_v57 = vld [vmem:[#allocation7 + $0x5] ss:$0 sm:$0xff]  ;;  %v923_v10 = vld [vmem:[#allocation7 + $0x6] ss:$0 sm:$0xff]  ;;  %s944_s8 = sshll.u32 %s1314_s27, 7 }
  0x7a   : > { %v428_v20 = vrot.slane %v426_v17, 5  ;;  %v450_v22 = vrot.slane %v448_v18, 6  ;;  %v472_v24 = vrot.slane %v470_v19, 7  ;;  %v522_v44 = vrot.slane %v520_v28, 2  ;;  %v924_v3 = vld [vmem:[%s1710_s5] ss:$0 sm:$0xff] }
  0x7b   : > { %964 = vmatpush3.bf16.msra.mxu0 %v1082_v6  ;;  %v489_v51 = vmul.f32 %v920_v40, %v1555_v7  ;;  %v490_v52 = vmul.f32 %v920_v40, %v1558_v9  ;;  %v504_v53 = vsel %vm503_vm8, %v501_v43, %v502_v27  ;;  %v505_v54 = vsel %vm503_vm8, %v502_v27, %v501_v43  ;;  %s385_s16 = scalar_lea.vmem [#allocation10], %s912_s6  ;;  %s1754_s2 = sld [smem:[#allocation26_spill]] }
  0x7c   : > { %965 = vmatprep.subr.bf16.mxu0 %v1332_v0  ;;  %v430_v31 = vsel %vm429_vm5, %v427_v14, %v428_v20  ;;  %v431_v32 = vsel %vm429_vm5, %v428_v20, %v427_v14  ;;  %v452_v33 = vsel %vm451_vm6, %v449_v15, %v450_v22  ;;  %v453_v34 = vsel %vm451_vm6, %v450_v22, %v449_v15  ;;  %s728_s9 = sshll.u32 %s385_s16, 4  ;;  %s709_s10 = scalar_lea.sflag [#allocation4], %s1524_s4  ;;  %s1637_s9 = int_to_ptr.vmem [resolvable:$true] %s728_s9 }
  0x7d   : > { %v436_v36 = vmul.f32 %v917_v16, %v431_v32  ;;  %v437_v37 = vmul.f32 %v917_v16, %v430_v31  ;;  %v458_v38 = vmul.f32 %v918_v21, %v453_v34  ;;  %v459_v39 = vmul.f32 %v918_v21, %v452_v33  ;;  %s1200_s21 = scalar_lea.vmem %s1637_s9, 128  ;;  %p1755_p0 = scmp.ne.s32.totalorder %s1753_s23, 0 }
  0x7e   : > { %v474_v41 = vsel %vm473_vm7, %v471_v23, %v472_v24  ;;  %v475_v42 = vsel %vm473_vm7, %v472_v24, %v471_v23  ;;  %v525_v58 = vsel %vm524_vm9, %v522_v44, %v523_v29  ;;  %v526_v59 = vsel %vm524_vm9, %v523_v29, %v522_v44  ;;  %p1201_p1 = scmp.ne.s32.totalorder %s1637_s9, %s1200_s21  ;;  %s1334_s22 = smov [#allocation10]  }
  0x7f   : > { %966 = vmatpush3.bf16.msra.mxu0 %v1083_v11  ;;  %v438_v46 = vadd.f32 %v916_v30, %v436_v36  ;;  %v439_v47 = vadd.f32 %v916_v30, %v437_v37  ;;  %v480_v48 = vmul.f32 %v919_v35, %v475_v42  ;;  %v481_v49 = vmul.f32 %v919_v35, %v474_v41  ;;  %s1204_s15 = sshll.u32 %s1334_s22, 4  ;;  %s1205_s15 = int_to_ptr.vmem [resolvable:$false] %s1204_s15 }
  0x80   : > { %967 = vmatprep.subr.bf16.mxu0 %v1332_v0  ;;  %v510_v60 = vmul.f32 %v921_v50, %v504_v53  ;;  %v544_v62 = vrot.slane %v1558_v9, 3  ;;  %v511_v4 = vmul.f32 %v921_v50, %v505_v54  ;;  %v543_v5 = vrot.slane %v541_v61, 3  ;;  %v1087_v9 = vld [vmem:[#allocation8] sm:$0xff]   ;;  %p1202_p10 = pnand %p1201_p1, %p1755_p0  ;;  %s1206_s0 = scalar_lea.vmem %s1205_s15, 256 }
  0x81   : > { %v460_v55 = vadd.f32 %v458_v38, %v438_v46  ;;  %v461_v56 = vadd.f32 %v459_v39, %v439_v47  ;;  %v531_v6 = vmul.f32 %v922_v57, %v525_v58  ;;  %v532_v8 = vmul.f32 %v922_v57, %v526_v59  ;;  %s1635_s20 = scalar_lea.hbm %s1754_s2, %s944_s8  ;;  %p1207_p3 = scmp.lt.s32.totalorder %s1637_s9, %s1205_s15 }
  0x82   : > { %v545_v14 = vsel %vm406_vm1, %v543_v5, %v544_v62  ;;  %v546_v7 = vsel %vm406_vm1, %v544_v62, %v543_v5  ;;  %p1203_p5 = pneg %p1202_p10  ;;  %p1208_p7 = scmp.lt.s32.totalorder %s1206_s0, %s1200_s21 }
  0x83   : > { %968 = vmatpush3.bf16.msra.mxu0 %v1084_v25  ;;  %v482_v1 = vadd.f32 %v480_v48, %v460_v55  ;;  %v483_v2 = vadd.f32 %v481_v49, %v461_v56  ;;  %v551_v16 = vmul.f32 %v923_v10, %v545_v14  ;;  %v552_v17 = vmul.f32 %v923_v10, %v546_v7 }
  0x84   : > { %969 = vmatprep.subr.bf16.mxu0 %v1332_v0  ;;  %p1209_p12 = por %p1208_p7, %p1207_p3 }
  0x85   : > { %v491_v11 = vadd.f32 %v489_v51, %v482_v1  ;;  %v492_v13 = vadd.f32 %v490_v52, %v483_v2 }
  0x86   : > { %p1210_p13 = pnand %p1209_p12, %p1203_p5 }
  0x87   : > { %970 = vmatpush3.bf16.msra.mxu0 %v1085_v45  ;;  %v512_v12 = vadd.f32 %v510_v60, %v491_v11  ;;  %v513_v15 = vadd.f32 %v511_v4, %v492_v13 }
  0x88   : > { %971 = vmatprep.subr.bf16.mxu0 %v1332_v0 }
  0x89   : > { %v533_v18 = vadd.f32 %v531_v6, %v512_v12  ;;  %v534_v19 = vadd.f32 %v532_v8, %v513_v15 }
  0x8b   : > { %972 = vmatpush3.bf16.msra.mxu0 %v1086_v63  ;;  %v553_v20 = vadd.f32 %v551_v16, %v533_v18  ;;  %v554_v21 = vadd.f32 %v552_v17, %v534_v19 }
  0x8c   : > { %973 = vmatprep.subr.bf16.mxu0 %v1332_v0 }
  0x8d   : > { %v555_v22 = vpack.c.bf16 %v554_v21, %v553_v20 }
  0x8f   : > { %974 = vmatpush3.bf16.msra.mxu0 %v1087_v9 }
  0x92   : > { %976 = vmatmul.mubr.bf16.vlgmr.msra.gmra.mxu0 %v555_v22 }
 0x152   : > { %v661_v23 = vpop.f32.mrf.mxu0 }
 0x153   : > { %v662_v24 = vadd.f32 %v924_v3, %v661_v23 }
 0x154   : > { %v977_v25 = vpop.f32.mrf.mxu0 }
 0x155   : > { %v670_v26 = vmul.f32 0.044715, %v662_v24  ;;  %v668_v40 = vmul.f32 0.5, %v662_v24 }
 0x156   : > { %v664_v27 = vpop.f32.mrf.mxu0 }
 0x157   : > { %v672_v28 = vmul.f32 %v670_v26, %v662_v24  ;;  %v665_v29 = vadd.f32 %v924_v3, %v664_v27 }
 0x158   : > { %v978_v30 = vpop.f32.mrf.mxu0 }
 0x159   : > { %v674_v31 = vmul.f32 %v672_v28, %v662_v24  ;;  %v671_v32 = vmul.f32 0.044715, %v665_v29  ;;  %v669_v43 = vmul.f32 0.5, %v665_v29 }
 0x15b   : > { %v676_v33 = vadd.f32 %v674_v31, %v662_v24  ;;  %v673_v34 = vmul.f32 %v671_v32, %v665_v29 }
 0x15d   : > { %v678_v35 = vmul.f32 0.7978846, %v676_v33  ;;  %v675_v0 = vmul.f32 %v673_v34, %v665_v29 }
 0x15f   : > { %1088 = vtanh.f32 %v678_v35  ;;  %v677_v36 = vadd.f32 %v675_v0, %v665_v29 }
 0x161   : > { %v679_v37 = vmul.f32 0.7978846, %v677_v36 }
 0x163   : > { %1090 = vtanh.f32 %v679_v37 }
 0x16c   : > { %v1089_v38 = vpop.eup %1088 }
 0x16d   : > { %v682_v39 = vadd.f32 1.0, %v1089_v38 }
 0x16f   : > { %v684_v42 = vmul.f32 %v682_v39, %v668_v40 }
 0x170   : > { %v1091_v41 = vpop.eup %1090 }
 0x171   : > { %v683_v44 = vadd.f32 1.0, %v1091_v41  ;;  %v696_v46 = vmul.f32 %v684_v42, %v684_v42 }
 0x173   : > { %v685_v45 = vmul.f32 %v683_v44, %v669_v43 }
 0x175   : > { %v697_v47 = vmul.f32 %v685_v45, %v685_v45  ;;  %v948_v48 = vpack.c.bf16 %v685_v45, %v684_v42 }
 0x177   : > { %v699_v49 = vadd.f32 %v697_v47, %v696_v46  ;;  %949 = vst [vmem:[%s385_s16] sm:$0xff] %v948_v48  }
 0x178   : > { %1213 = shalt.err (!%p1210_p13)
}
 0x179   : > { %s1214_s6 = scalar_lea.hbm %s1635_s20, 128  ;;  %s1218_s30 = scalar_lea.hbm %s1754_s2, 256 }
 0x17a   : > { %p1215_p4 = scmp.ne.s32.totalorder %s1635_s20, %s1214_s6  ;;  %p1219_p2 = scmp.lt.s32.totalorder %s1635_s20, %s1754_s2 }
 0x17b   : > { %p1220_p6 = scmp.lt.s32.totalorder %s1218_s30, %s1214_s6 }
 0x17c   : > { %p1216_p9 = pnand %p1215_p4, %p1755_p0 }
 0x17d   : > { %p1221_p11 = por %p1220_p6, %p1219_p2 }
 0x17e   : > { %p1217_p8 = pneg %p1216_p9 }
 0x180   : > { %p1222_p1 = pnand %p1221_p11, %p1217_p8 }
 0x182   : > { %1225 = shalt.err (!%p1222_p1)
}
 0x183   : > { %s1335_s13 = smov 64   ;;  %s1336_s8 = smov 4   ;;  %v700_v50 = vrot.slane %v699_v49, 4  ;;  %v698_v55 = vld [vmem:[%s1622_s14] sm:$0x1] }
 0x184   : > { %991 = dma.vmem_to_hbm [thread:$0]  (%p1755_p0), %s1637_s9, 128, %s1635_s20, %s709_s10, %s1335_s13, %s1335_s13, %s1336_s8  }
 0x185   : > { %v701_v51 = vadd.f32 %v700_v50, %v699_v49  ;;  %s938_s16 = sshll.u32 %s1314_s27, 4  ;;  %s744_s18 = sshll.u32 %s1622_s14, 4  ;;  %s745_s18 = int_to_ptr.vmem [resolvable:$true] %s744_s18 }
 0x186   : > { %s1756_s22 = sld [smem:[#allocation27_spill]]  ;;  %s714_s0 = scalar_lea.sflag [#allocation12], %s1524_s4 }
 0x187   : > { %v702_v52 = vrot.slane %v701_v51, 2  ;;  %s1226_s6 = scalar_lea.vmem %s745_s18, 16  ;;  %s1337_s9 = smov [#allocation11]  }
 0x188   : > { %p1227_p10 = scmp.ne.s32.totalorder %s745_s18, %s1226_s6  ;;  %s1230_s20 = sshll.u32 %s1337_s9, 4  ;;  %s1231_s20 = int_to_ptr.vmem [resolvable:$false] %s1230_s20 }
 0x189   : > { %v703_v53 = vadd.f32 %v702_v52, %v701_v51  ;;  %s1232_s10 = scalar_lea.vmem %s1231_s20, 32  ;;  %p1233_p7 = scmp.lt.s32.totalorder %s745_s18, %s1231_s20 }
 0x18a   : > { %p1228_p5 = pnand %p1227_p10, %p1755_p0  ;;  %p1234_p12 = scmp.lt.s32.totalorder %s1232_s10, %s1226_s6 }
 0x18b   : > { %v704_v54 = vrot.slane %v703_v53, 1 }
 0x18c   : > { %s742_s15 = scalar_lea.hbm %s1756_s22, %s938_s16  ;;  %p1229_p3 = pneg %p1228_p5 }
 0x18d   : > { %v705_v56 = vadd.f32 %v704_v54, %v703_v53  ;;  %p1235_p13 = por %p1234_p12, %p1233_p7 }
 0x18f   : > { %v706_v57 = vadd.f32 %v705_v56, %v698_v55  ;;  %p1236_p4 = pnand %p1235_p13, %p1229_p3 }
 0x191   : > { %707 = vst [vmem:[%s1622_s14] sm:$0x1] %v706_v57 }
 0x192   : > { %1239 = shalt.err (!%p1236_p4)
}
 0x193   : > { %s1240_s27 = scalar_lea.hbm %s742_s15, 16  ;;  %s1244_s7 = scalar_lea.hbm %s1756_s22, 32 }
 0x194   : > { %p1241_p9 = scmp.ne.s32.totalorder %s742_s15, %s1240_s27  ;;  %p1245_p6 = scmp.lt.s32.totalorder %s742_s15, %s1756_s22 }
 0x195   : > { %p1246_p11 = scmp.lt.s32.totalorder %s1244_s7, %s1240_s27 }
 0x196   : > { %p1242_p8 = pnand %p1241_p9, %p1755_p0 }
 0x197   : > { %p1247_p1 = por %p1246_p11, %p1245_p6 }
 0x198   : > { %p1243_p2 = pneg %p1242_p8 }
 0x19a   : > { %p1248_p10 = pnand %p1247_p1, %p1243_p2 }
 0x19c   : > { %1251 = shalt.err (!%p1248_p10)
}
 0x19d   : > { %992 = dma.vmem_to_hbm [thread:$0]  (%p1755_p0), %s745_s18, 16, %s742_s15, %s714_s0  }
 0x19e PF: > { %s1757_s11 = sld [smem:[#allocation19_spill]]  ;;  %p1760_p3 = scmp.ge.s32.totalorder %s1322_s29, 2 }
 0x19f   : > { %s1758_s17 = sld [smem:[#allocation21_spill]] }
 0x1a4   : > { %s756_s13 = sand.u32 1, %s1757_s11  }
 0x1a5   : > { %p1759_p5 = scmp.ne.s32.totalorder %s1758_s17, 0  ;;  %s757_s8 = scalar_lea.sflag [#allocation4], %s756_s13 }
 0x1a7   : > { %p1010_p7 = pnand %p1760_p3, %p1759_p5 }
 0x1a9   : > { %p1011_p12 = pneg %p1010_p7 }
 0x1ab   : > { %1293 = dma.done.wait (%p1011_p12), %s757_s8, 128  }
 0x1ac   : > { %1295 = vsyncadd (%p1011_p12), %s757_s8, 4294967168  ;;  %s766_s16 = scalar_lea.sflag [#allocation12], %s756_s13 }
 0x1ad   : > { %1297 = dma.done.wait (%p1011_p12), %s766_s16, 16  }
 0x1ae   : > { %1299 = vsyncadd (%p1011_p12), %s766_s16, 4294967280  ;;  %s31_s29 = sadd.s32 1, %s1322_s29   ;;  %s1761_s23 = sld [smem:[#allocation22_spill]] }
 0x1af   : > { %p28_p13 = scmp.ge.s32.totalorder %s31_s29, 4   ;;  %s1762_s24 = smov %s1306_s25 }
 0x1b0   : > { %s1763_s25 = smov %s1310_s26  ;;  %s1764_s26 = smov %s1508_s19 }
 0x1b1   : > { %s1765_s27 = smov %s1318_s28  ;;  %30 = sbr.rel (!%p28_p13) target bundleno = 17 (0x11), region = 131 }
 0x1b4   : > { %s1766_s28 = smov %s1761_s23 }
 0x1b6   :  { %770 = vsyncpa [#allocation3], 1 }
 0x1b7   :  { %772 = vsyncpa [#allocation3 + $0x1], 1 }
 0x1b8   :  { %773 = vsyncpa [#allocation6], 1 }
 0x1b9   :  { %775 = vsyncpa [#allocation6 + $0x1], 1 }
 0x1ba   :  { %776 = vsyncpa [#allocation9], 1 }
 0x1bb   :  { %777 = vsyncpa [#allocation4], 1 }
 0x1bc   :  { %779 = vsyncpa [#allocation4 + $0x1], 1 }
 0x1bd   :  { %780 = vsyncpa [#allocation12], 1 }
 0x1be   :  { %782 = vsyncpa [#allocation12 + $0x1], 1 }

// kernel: tpu_custom_call.1
= control target key start
LH: loop header
LB: loop body
LE: loop exit
PB: predicated region body
PF: predicated region fallthrough
CT: control target
= control target key end

     0   :  { %s1705_s0 = inlined_call_operand.hbm [shape: f32[2,16,128], index: 0, kind: input, shape index: {}]   ;;  %s1706_s1 = inlined_call_operand.hbm [shape: f32[2,1,8,128], index: 1, kind: input, shape index: {}]   ;;  %s1707_s2 = inlined_call_operand.hbm [shape: f32[7,128], index: 2, kind: input, shape index: {}]   ;;  %s1708_s3 = inlined_call_operand.vmem [shape: f32[1,128], index: 3, kind: input, shape index: {}]   ;;  %s1709_s4 = inlined_call_operand.hbm [shape: bf16[128,128], index: 4, kind: input, shape index: {}]   ;;  %s1710_s5 = inlined_call_operand.vmem [shape: f32[1,128], index: 5, kind: input, shape index: {}]   ;;  %s1711_s6 = inlined_call_operand.hbm [shape: bf16[2,16,128], index: 6, kind: output, shape index: {0}]   ;;  %s1712_s7 = inlined_call_operand.hbm [shape: f32[2,1,128], index: 7, kind: output, shape index: {1}]  }
   0x1   :  { %1725 = sst [smem:[#allocation23_spill]] %s1705_s0 }
   0x2   :  { %1726 = sst [smem:[#allocation24_spill]] %s1707_s2 }
   0x3   :  { %1727 = sst [smem:[#allocation25_spill]] %s1709_s4 }
   0x4   :  { %1728 = sst [smem:[#allocation26_spill]] %s1711_s6 }
   0x5   :  { %1729 = sst [smem:[#allocation27_spill]] %s1712_s7 }
   0x6   :  { %13 = vsyncpa [#allocation3], 0 }
   0x7   :  { %15 = vsyncpa [#allocation3 + $0x1], 0 }
   0x8   :  { %16 = vsyncpa [#allocation6], 0 }
   0x9   :  { %18 = vsyncpa [#allocation6 + $0x1], 0 }
   0xa   :  { %19 = vsyncpa [#allocation9], 0 }
   0xb   :  { %20 = vsyncpa [#allocation4], 0 }
   0xc   :  { %22 = vsyncpa [#allocation4 + $0x1], 0 }
   0xd   :  { %23 = vsyncpa [#allocation12], 0 }
   0xe   :  { %25 = vsyncpa [#allocation12 + $0x1], 0  ;;  %s1378_s24 = smov 0   ;;  %s1380_s25 = smov 0  }
   0xf   :  { %s1382_s26 = smov 0   ;;  %s1384_s27 = smov 0  }
  0x10   :  { %s1386_s28 = smov 0   ;;  %s1388_s29 = smov 0  }
  0x11 LB: > { %1730 = sst [smem:[#allocation19_spill]] %s1302_s24  ;;  %s1409_s30 = sadd.s32 4294967295, %s1322_s29   ;;  %s1322_s29 = sphi %s1388_s29, %s31_s29   ;;  %s1318_s28 = sphi %s1386_s28, %s1766_s28   ;;  %s1314_s27 = sphi %s1384_s27, %s1765_s27   ;;  %s1310_s26 = sphi %s1382_s26, %s1764_s26   ;;  %s1306_s25 = sphi %s1380_s25, %s1763_s25   ;;  %s1302_s24 = sphi %s1378_s24, %s1762_s24  }
  0x12   : > { %s900_s8 = sadd.s32 4294967294, %s1322_s29   ;;  %p59_p0 = scmp.ne.s32.totalorder %s1310_s26, %s1306_s25 }
  0x13   : > { %p60_p1 = scmp.eq.s32.totalorder %s1322_s29, 0  ;;  %p65_p2 = scmp.ne.s32.totalorder %s1306_s25, %s1302_s24 }
  0x14   : > { %p1714_p3 = scmp.eq.s32.totalorder %s1409_s30, 0  ;;  %p203_p4 = scmp.eq.s32.totalorder %s1409_s30, 1 }
  0x15   : > { %p1420_p5 = por %p60_p1, %p59_p0  ;;  %p209_p6 = scmp.eq.s32.totalorder %s900_s8, 1 }
  0x16   : > { %p1426_p7 = por %p1714_p3, %p65_p2  ;;  %p1430_p8 = por %p203_p4, %p59_p0 }
  0x17   : > { %p1434_p9 = por %p209_p6, %p65_p2  ;;  %p901_p10 = scmp.ge.s32.totalorder %s1322_s29, 1 }
  0x18   : > { %s1732_s11 = scalar_select %p1426_p7, 1, 0 }
  0x19   : > { %s1733_s12 = scalar_select %p1430_p8, 1, 0 }
  0x1a   : > { %s1735_s13 = scalar_select %p1434_p9, 1, 0 }
  0x1b   : > { %1734 = sst [smem:[#allocation20_spill]] %s1733_s12  ;;  %p242_p11 = scmp.lt.s32.totalorder %s1322_s29, 3 }
  0x1c   : > { %1736 = sst [smem:[#allocation21_spill]] %s1735_s13  ;;  %s1324_s15 = smov [#allocation7]  }
  0x1d   : > { %p1441_p13 = pnand %p901_p10, %p242_p11  ;;  %s255_s16 = sshll.u32 %s1324_s15, 4  ;;  %s256_s16 = int_to_ptr.vmem [resolvable:$true] %s255_s16 }
  0x1e   : > { %p1018_p1 = scmp.lt.s32.totalorder %s1322_s29, 2  ;;  %s1325_s18 = smov [#allocation8]  }
  0x1f   : > { %s1737_s14 = scalar_select %p1441_p13, 1, 0 }
  0x20   : > { %p995_p0 = pneg %p1441_p13  ;;  %p1450_p4 = pnand %p1018_p1, %p1420_p5 }
  0x21   : > { %s268_s19 = sshll.u32 %s1325_s18, 4  ;;  %s1103_s21 = scalar_lea.vmem %s256_s16, 128  ;;  %s269_s19 = int_to_ptr.vmem [resolvable:$true] %s268_s19 }
  0x22   : > { %s1738_s17 = scalar_select %p1450_p4, 1, 0 }
  0x23   : > { %p1456_p2 = pnand %p995_p0, %p1714_p3  ;;  %p1104_p10 = scmp.ne.s32.totalorder %s256_s16, %s1103_s21 }
  0x24   : > { %p1111_p1 = scmp.lt.s32.totalorder %s256_s16, %s256_s16  ;;  %p1112_p12 = scmp.lt.s32.totalorder %s1103_s21, %s1103_s21 }
  0x25   : > { %p1094_p6 = pneg %p1456_p2 }
  0x26   : > { %p1113_p9 = por %p1112_p12, %p1111_p1 }
  0x27   : > { %p1106_p5 = pnand %p1104_p10, %p1094_p6 }
  0x29   : > { %p1107_p11 = pneg %p1106_p5 }
  0x2b   : > { %p1114_p8 = pnand %p1113_p9, %p1107_p11 }
  0x2d   : > { %1117 = shalt.err (!%p1114_p8)
}
  0x2e   : > { %s1740_s2 = sld [smem:[#allocation24_spill]]  ;;  %s1129_s8 = scalar_lea.vmem %s269_s19, 1024 }
  0x2f   : > { %p1130_p0 = scmp.ne.s32.totalorder %s269_s19, %s1129_s8  ;;  %p1137_p10 = scmp.lt.s32.totalorder %s269_s19, %s269_s19 }
  0x30   : > { %p1138_p5 = scmp.lt.s32.totalorder %s1129_s8, %s1129_s8 }
  0x31   : > { %p1132_p3 = pnand %p1130_p0, %p1094_p6 }
  0x32   : > { %p1139_p13 = por %p1138_p5, %p1137_p10 }
  0x33   : > { %p1133_p7 = pneg %p1132_p3 }
  0x34   : > { %998 = dma.hbm_to_vmem [thread:$0]  (!%p1456_p2), %s1740_s2, 128, %s256_s16, [#allocation6]  }
  0x35   : > { %p1140_p4 = pnand %p1139_p13, %p1133_p7 }
  0x37   : > { %1143 = shalt.err (!%p1140_p4)
}
  0x38   : > { %s1326_s10 = smov 64   ;;  %s1327_s15 = smov 4  }
  0x39   : > { %s1741_s4 = sld [smem:[#allocation25_spill]]  ;;  %s1479_s21 = sand.u32 1, %s1310_s26  }
  0x3a   : > { %s43_s22 = sadd.s32 1, %s1318_s28  ;;  %s905_s23 = sshll.u32 %s1479_s21, 4 }
  0x3b   : > { %p45_p3 = scmp.ge.s32.totalorder %s43_s22, 2  ;;  %s941_s8 = sshll.u32 %s1318_s28, 8 }
  0x3c   : > { %s289_s9 = scalar_lea.vmem [#allocation2], %s905_s23  ;;  %s1743_s0 = sld [smem:[#allocation23_spill]] }
  0x3d   : > { %s298_s2 = sshll.u32 %s289_s9, 4  ;;  %s1768_s22 = smov (%p45_p3, %s43_s22), 0  ;;  %s299_s2 = int_to_ptr.vmem [resolvable:$true] %s298_s2 }
  0x3e   : > { %1742 = sst [smem:[#allocation22_spill]] %s1768_s22  ;;  %p1745_p8 = scmp.ne.s32.totalorder %s1738_s17, 0 }
  0x3f   : > { %1001 = dma.hbm_to_vmem [thread:$0]  (!%p1456_p2), %s1741_s4, 1024, %s269_s19, [#allocation9], %s1326_s10, %s1326_s10, %s1327_s15  }
  0x40   : > { %s47_s19 = ssub.s32 %s1318_s28, %s1768_s22  ;;  %s286_s15 = scalar_lea.sflag [#allocation3], %s1479_s21 }
  0x41   : > { %p1491_p7 = scmp.eq.s32.totalorder %s47_s19, 0  ;;  %p1146_p9 = pneg %p1745_p8 }
  0x42   : > { %s297_s20 = scalar_lea.hbm %s1743_s0, %s941_s8  ;;  %s1157_s16 = scalar_lea.vmem %s299_s2, 256 }
  0x43   : > { %p1158_p12 = scmp.ne.s32.totalorder %s299_s2, %s1157_s16  ;;  %s1328_s9 = smov [#allocation2]  }
  0x44   : > { %s1162_s18 = sshll.u32 %s1328_s9, 4  ;;  %s1163_s18 = int_to_ptr.vmem [resolvable:$false] %s1162_s18 }
  0x45   : > { %p1160_p13 = pnand %p1158_p12, %p1146_p9  ;;  %s1164_s24 = scalar_lea.vmem %s1163_s18, 512 }
  0x46   : > { %p1165_p2 = scmp.lt.s32.totalorder %s299_s2, %s1163_s18  ;;  %p1166_p6 = scmp.lt.s32.totalorder %s1164_s24, %s1157_s16 }
  0x47   : > { %p1161_p4 = pneg %p1160_p13 }
  0x48   : > { %p1167_p11 = por %p1166_p6, %p1165_p2 }
  0x4a   : > { %p1168_p1 = pnand %p1167_p11, %p1161_p4 }
  0x4c   : > { %1171 = shalt.err (!%p1168_p1)
}
  0x4d   : > { %s1329_s13 = smov 128   ;;  %s1330_s23 = smov 8  }
  0x4e   : > { %1005 = dma.hbm_to_vmem [thread:$0]  (!%p1745_p8), %s297_s20, 256, %s299_s2, %s286_s15, %s1329_s13, %s1329_s13, %s1330_s23  }
  0x4f   : > { %s1746_s8 = sadd.s32 1, %s1310_s26  ;;  %s308_s16 = sand.u32 1, %s1322_s29  }
  0x50   : > { %s1508_s19 = scalar_select %p1491_p7, %s1310_s26, %s1746_s8  }
  0x51   : > { %s908_s9 = sshll.u32 %s1479_s21, 3  ;;  %s909_s18 = sshll.u32 %s1318_s28, 7 }
  0x52   : > { %s312_s24 = scalar_lea.vmem [#allocation5], %s908_s9  ;;  %s318_s7 = scalar_lea.hbm %s1706_s1, %s909_s18 }
  0x53   : > { %s320_s0 = sshll.u32 %s312_s24, 4  ;;  %s309_s6 = scalar_lea.sflag [#allocation6], %s308_s16  ;;  %s321_s0 = int_to_ptr.vmem [resolvable:$true] %s320_s0 }
  0x54   : > { %s1185_s12 = scalar_lea.vmem %s321_s0, 128  ;;  %s1331_s2 = smov [#allocation5]  }
  0x55   : > { %p1186_p0 = scmp.ne.s32.totalorder %s321_s0, %s1185_s12  ;;  %s1190_s20 = sshll.u32 %s1331_s2, 4  ;;  %s1191_s20 = int_to_ptr.vmem [resolvable:$false] %s1190_s20 }
  0x56   : > { %s1192_s10 = scalar_lea.vmem %s1191_s20, 256  ;;  %p1193_p3 = scmp.lt.s32.totalorder %s321_s0, %s1191_s20 }
  0x57   : > { %p1188_p10 = pnand %p1186_p0, %p1146_p9  ;;  %p1194_p7 = scmp.lt.s32.totalorder %s1192_s10, %s1185_s12 }
  0x59   : > { %p1189_p5 = pneg %p1188_p10  ;;  %p1195_p12 = por %p1194_p7, %p1193_p3 }
  0x5b   : > { %p1196_p13 = pnand %p1195_p12, %p1189_p5 }
  0x5d   : > { %1199 = shalt.err (!%p1196_p13)
}
  0x5e   : > { %1008 = dma.hbm_to_vmem [thread:$0]  (!%p1745_p8), %s318_s7, 128, %s321_s0, %s309_s6  }
  0x5f   : > { %p1747_p4 = scmp.ne.s32.totalorder %s1737_s14, 0 }
  0x60   : > { %s1524_s4 = sand.u32 (!%p1747_p4), 1, %s1306_s25   ;;  %p1748_p9 = scmp.ne.s32.totalorder (!%p1747_p4), %s1732_s11, 0 }
  0x61   : > { %329 = sbr.rel (%p1747_p4) target bundleno = 414 (0x19e), region = 44  ;;  %s911_s21 = sshll.u32 (!%p1747_p4), %s1524_s4, 4 }
  0x62   : > { %s332_s22 = scalar_lea.sflag (!%p1747_p4), [#allocation3], %s1524_s4  ;;  %s335_s15 = scalar_lea.vmem (!%p1747_p4), [#allocation2], %s911_s21 }
  0x66   : > { %1277 = dma.done.wait (%p1748_p9), %s332_s22, 256  }
  0x67   : > { %1279 = vsyncadd (%p1748_p9), %s332_s22, 4294967040  ;;  %s340_s0 = sand.u32 1, %s1409_s30   ;;  %s912_s6 = sshll.u32 %s1524_s4, 3 }
  0x68   : > { %s341_s7 = scalar_lea.sflag [#allocation6], %s340_s0  ;;  %s344_s12 = scalar_lea.vmem [#allocation5], %s912_s6 }
  0x69   : > { %1281 = dma.done.wait (%p1748_p9), %s341_s7, 128  }
  0x6a   : > { %1283 = vsyncadd (%p1748_p9), %s341_s7, 4294967168  ;;  %p1749_p8 = scmp.eq.s32.totalorder %s1409_s30, 0 }
  0x6c   : > { %1285 = dma.done.wait (%p1749_p8), [#allocation6], 128   ;;  %p1750_p2 = pmov %p1749_p8 }
  0x6e   : > { %1287 = vsyncadd (%p1750_p2), [#allocation6], 4294967168  ;;  %p1751_p6 = pmov %p1750_p2 }
  0x6f   : > { %p1752_p11 = pmov %p1750_p2 }
  0x70   : > { %1289 = dma.done.wait (%p1751_p6), [#allocation9], 1024  }
  0x71   : > { %1291 = vsyncadd (%p1752_p11), [#allocation9], 4294966272  ;;  %v1332_v0 = vmov 0.0   ;;  %vm1333_vm0 = vmmov 0   ;;  %v404_v1 = vlaneseq  ;;  %v1080_v2 = vld [vmem:[#allocation8 + $0x38] sm:$0xff]   ;;  %v1081_v4 = vld [vmem:[#allocation8 + $0x30] sm:$0xff]  }
  0x72   : > { %959 = vmatprep.subr.bf16.mxu0 %v1332_v0  ;;  %975 = vmatprep.mubr.msk.bf16.mxu0 %vm1333_vm0, %v1332_v0  ;;  %v1082_v6 = vld [vmem:[#allocation8 + $0x28] sm:$0xff]   ;;  %v1558_v9 = vld [vmem:[%s335_s15 + $0x8] sm:$0xff]  ;;  %v917_v16 = vld [vmem:[#allocation7] ss:$0 sm:$0xff]  ;;  %s1622_s14 = scalar_lea.vmem [#allocation11], %s1524_s4  ;;  %s1753_s23 = sld [smem:[#allocation20_spill]] }
  0x73   : > { %v1550_v3 = vshrl.u32 %v404_v1, 7  ;;  %960 = vmatpush3.bf16.msra.mxu0 %v1080_v2  ;;  %v1555_v7 = vld [vmem:[%s335_s15] sm:$0xff]  ;;  %v1083_v11 = vld [vmem:[#allocation8 + $0x20] sm:$0xff]   ;;  %v502_v27 = vrot.slane %v1558_v9, 1  ;;  %v523_v29 = vrot.slane %v1558_v9, 2  ;;  %v1085_v45 = vld [vmem:[#allocation8 + $0x10] sm:$0xff]  }
  0x74   : > { %961 = vmatprep.subr.bf16.mxu0 %v1332_v0  ;;  %v402_v8 = vld [vmem:[%s344_s12] sm:$0xff]  ;;  %v427_v14 = vrot.slane %v1555_v7, 5  ;;  %v449_v15 = vrot.slane %v1555_v7, 6  ;;  %v918_v21 = vld [vmem:[#allocation7 + $0x1] ss:$0 sm:$0xff]  ;;  %v471_v23 = vrot.slane %v1555_v7, 7 }
  0x75   : > { %v409_v5 = vadd.s32 8, %v1550_v3  ;;  %vm406_vm1 = vcmp.lt.s32.totalorder %v1550_v3, 5  ;;  %v403_v10 = vrot.slane %v402_v8, 3  ;;  %vm429_vm5 = vcmp.lt.s32.totalorder %v1550_v3, 3  ;;  %v1084_v25 = vld [vmem:[#allocation8 + $0x18] sm:$0xff]   ;;  %v1086_v63 = vld [vmem:[#allocation8 + $0x8] sm:$0xff]  }
  0x76   : > { %vm451_vm6 = vcmp.lt.s32.totalorder %v1550_v3, 2  ;;  %vm473_vm7 = vcmp.lt.s32.totalorder %v1550_v3, 1  ;;  %vm503_vm8 = vcmp.lt.s32.totalorder %v1550_v3, 7  ;;  %vm524_vm9 = vcmp.lt.s32.totalorder %v1550_v3, 6  ;;  %v916_v30 = vld [vmem:[%s1708_s3] ss:$0 sm:$0xff] }
  0x77   : > { %962 = vmatpush3.bf16.msra.mxu0 %v1081_v4  ;;  %vm420_vm2 = vcmp.ge.s32.totalorder %v409_v5, 13  ;;  %vm442_vm3 = vcmp.ge.s32.totalorder %v409_v5, 14  ;;  %vm464_vm4 = vcmp.ge.s32.totalorder %v409_v5, 15  ;;  %v407_v12 = vsel %vm406_vm1, %v403_v10, 0.0  ;;  %v919_v35 = vld [vmem:[#allocation7 + $0x2] ss:$0 sm:$0xff] }
  0x78   : > { %963 = vmatprep.subr.bf16.mxu0 %v1332_v0  ;;  %v408_v13 = vsel %vm406_vm1, 0.0, %v403_v10  ;;  %v499_v26 = vsel %vm473_vm7, %v407_v12, %v1555_v7  ;;  %v520_v28 = vsel %vm451_vm6, %v407_v12, %v1555_v7  ;;  %v920_v40 = vld [vmem:[#allocation7 + $0x3] ss:$0 sm:$0xff]  ;;  %v921_v50 = vld [vmem:[#allocation7 + $0x4] ss:$0 sm:$0xff]  ;;  %v541_v61 = vsel %vm429_vm5, %v407_v12, %v1555_v7  ;;  %399 = vst [vmem:[%s1622_s14] sm:$0x1] %v1332_v0 }
  0x79   : > { %v426_v17 = vsel %vm420_vm2, %v408_v13, %v1558_v9  ;;  %v448_v18 = vsel %vm442_vm3, %v408_v13, %v1558_v9  ;;  %v470_v19 = vsel %vm464_vm4, %v408_v13, %v1558_v9  ;;  %v501_v43 = vrot.slane %v499_v26, 1  ;;  %v922_v57 = vld [vmem:[#allocation7 + $0x5] ss:$0 sm:$0xff]  ;;  %v923_v10 = vld [vmem:[#allocation7 + $0x6] ss:$0 sm:$0xff]  ;;  %s944_s8 = sshll.u32 %s1314_s27, 7 }
  0x7a   : > { %v428_v20 = vrot.slane %v426_v17, 5  ;;  %v450_v22 = vrot.slane %v448_v18, 6  ;;  %v472_v24 = vrot.slane %v470_v19, 7  ;;  %v522_v44 = vrot.slane %v520_v28, 2  ;;  %v924_v3 = vld [vmem:[%s1710_s5] ss:$0 sm:$0xff] }
  0x7b   : > { %964 = vmatpush3.bf16.msra.mxu0 %v1082_v6  ;;  %v489_v51 = vmul.f32 %v920_v40, %v1555_v7  ;;  %v490_v52 = vmul.f32 %v920_v40, %v1558_v9  ;;  %v504_v53 = vsel %vm503_vm8, %v501_v43, %v502_v27  ;;  %v505_v54 = vsel %vm503_vm8, %v502_v27, %v501_v43  ;;  %s385_s16 = scalar_lea.vmem [#allocation10], %s912_s6  ;;  %s1754_s2 = sld [smem:[#allocation26_spill]] }
  0x7c   : > { %965 = vmatprep.subr.bf16.mxu0 %v1332_v0  ;;  %v430_v31 = vsel %vm429_vm5, %v427_v14, %v428_v20  ;;  %v431_v32 = vsel %vm429_vm5, %v428_v20, %v427_v14  ;;  %v452_v33 = vsel %vm451_vm6, %v449_v15, %v450_v22  ;;  %v453_v34 = vsel %vm451_vm6, %v450_v22, %v449_v15  ;;  %s728_s9 = sshll.u32 %s385_s16, 4  ;;  %s709_s10 = scalar_lea.sflag [#allocation4], %s1524_s4  ;;  %s1637_s9 = int_to_ptr.vmem [resolvable:$true] %s728_s9 }
  0x7d   : > { %v436_v36 = vmul.f32 %v917_v16, %v431_v32  ;;  %v437_v37 = vmul.f32 %v917_v16, %v430_v31  ;;  %v458_v38 = vmul.f32 %v918_v21, %v453_v34  ;;  %v459_v39 = vmul.f32 %v918_v21, %v452_v33  ;;  %s1200_s21 = scalar_lea.vmem %s1637_s9, 128  ;;  %p1755_p0 = scmp.ne.s32.totalorder %s1753_s23, 0 }
  0x7e   : > { %v474_v41 = vsel %vm473_vm7, %v471_v23, %v472_v24  ;;  %v475_v42 = vsel %vm473_vm7, %v472_v24, %v471_v23  ;;  %v525_v58 = vsel %vm524_vm9, %v522_v44, %v523_v29  ;;  %v526_v59 = vsel %vm524_vm9, %v523_v29, %v522_v44  ;;  %p1201_p1 = scmp.ne.s32.totalorder %s1637_s9, %s1200_s21  ;;  %s1334_s22 = smov [#allocation10]  }
  0x7f   : > { %966 = vmatpush3.bf16.msra.mxu0 %v1083_v11  ;;  %v438_v46 = vadd.f32 %v916_v30, %v436_v36  ;;  %v439_v47 = vadd.f32 %v916_v30, %v437_v37  ;;  %v480_v48 = vmul.f32 %v919_v35, %v475_v42  ;;  %v481_v49 = vmul.f32 %v919_v35, %v474_v41  ;;  %s1204_s15 = sshll.u32 %s1334_s22, 4  ;;  %s1205_s15 = int_to_ptr.vmem [resolvable:$false] %s1204_s15 }
  0x80   : > { %967 = vmatprep.subr.bf16.mxu0 %v1332_v0  ;;  %v510_v60 = vmul.f32 %v921_v50, %v504_v53  ;;  %v544_v62 = vrot.slane %v1558_v9, 3  ;;  %v511_v4 = vmul.f32 %v921_v50, %v505_v54  ;;  %v543_v5 = vrot.slane %v541_v61, 3  ;;  %v1087_v9 = vld [vmem:[#allocation8] sm:$0xff]   ;;  %p1202_p10 = pnand %p1201_p1, %p1755_p0  ;;  %s1206_s0 = scalar_lea.vmem %s1205_s15, 256 }
  0x81   : > { %v460_v55 = vadd.f32 %v458_v38, %v438_v46  ;;  %v461_v56 = vadd.f32 %v459_v39, %v439_v47  ;;  %v531_v6 = vmul.f32 %v922_v57, %v525_v58  ;;  %v532_v8 = vmul.f32 %v922_v57, %v526_v59  ;;  %s1635_s20 = scalar_lea.hbm %s1754_s2, %s944_s8  ;;  %p1207_p3 = scmp.lt.s32.totalorder %s1637_s9, %s1205_s15 }
  0x82   : > { %v545_v14 = vsel %vm406_vm1, %v543_v5, %v544_v62  ;;  %v546_v7 = vsel %vm406_vm1, %v544_v62, %v543_v5  ;;  %p1203_p5 = pneg %p1202_p10  ;;  %p1208_p7 = scmp.lt.s32.totalorder %s1206_s0, %s1200_s21 }
  0x83   : > { %968 = vmatpush3.bf16.msra.mxu0 %v1084_v25  ;;  %v482_v1 = vadd.f32 %v480_v48, %v460_v55  ;;  %v483_v2 = vadd.f32 %v481_v49, %v461_v56  ;;  %v551_v16 = vmul.f32 %v923_v10, %v545_v14  ;;  %v552_v17 = vmul.f32 %v923_v10, %v546_v7 }
  0x84   : > { %969 = vmatprep.subr.bf16.mxu0 %v1332_v0  ;;  %p1209_p12 = por %p1208_p7, %p1207_p3 }
  0x85   : > { %v491_v11 = vadd.f32 %v489_v51, %v482_v1  ;;  %v492_v13 = vadd.f32 %v490_v52, %v483_v2 }
  0x86   : > { %p1210_p13 = pnand %p1209_p12, %p1203_p5 }
  0x87   : > { %970 = vmatpush3.bf16.msra.mxu0 %v1085_v45  ;;  %v512_v12 = vadd.f32 %v510_v60, %v491_v11  ;;  %v513_v15 = vadd.f32 %v511_v4, %v492_v13 }
  0x88   : > { %971 = vmatprep.subr.bf16.mxu0 %v1332_v0 }
  0x89   : > { %v533_v18 = vadd.f32 %v531_v6, %v512_v12  ;;  %v534_v19 = vadd.f32 %v532_v8, %v513_v15 }
  0x8b   : > { %972 = vmatpush3.bf16.msra.mxu0 %v1086_v63  ;;  %v553_v20 = vadd.f32 %v551_v16, %v533_v18  ;;  %v554_v21 = vadd.f32 %v552_v17, %v534_v19 }
  0x8c   : > { %973 = vmatprep.subr.bf16.mxu0 %v1332_v0 }
  0x8d   : > { %v555_v22 = vpack.c.bf16 %v554_v21, %v553_v20 }
  0x8f   : > { %974 = vmatpush3.bf16.msra.mxu0 %v1087_v9 }
  0x92   : > { %976 = vmatmul.mubr.bf16.vlgmr.msra.gmra.mxu0 %v555_v22 }
 0x152   : > { %v661_v23 = vpop.f32.mrf.mxu0 }
 0x153   : > { %v662_v24 = vadd.f32 %v924_v3, %v661_v23 }
 0x154   : > { %v977_v25 = vpop.f32.mrf.mxu0 }
 0x155   : > { %v670_v26 = vmul.f32 0.044715, %v662_v24  ;;  %v668_v40 = vmul.f32 0.5, %v662_v24 }
 0x156   : > { %v664_v27 = vpop.f32.mrf.mxu0 }
 0x157   : > { %v672_v28 = vmul.f32 %v670_v26, %v662_v24  ;;  %v665_v29 = vadd.f32 %v924_v3, %v664_v27 }
 0x158   : > { %v978_v30 = vpop.f32.mrf.mxu0 }
 0x159   : > { %v674_v31 = vmul.f32 %v672_v28, %v662_v24  ;;  %v671_v32 = vmul.f32 0.044715, %v665_v29  ;;  %v669_v43 = vmul.f32 0.5, %v665_v29 }
 0x15b   : > { %v676_v33 = vadd.f32 %v674_v31, %v662_v24  ;;  %v673_v34 = vmul.f32 %v671_v32, %v665_v29 }
 0x15d   : > { %v678_v35 = vmul.f32 0.7978846, %v676_v33  ;;  %v675_v0 = vmul.f32 %v673_v34, %v665_v29 }
 0x15f   : > { %1088 = vtanh.f32 %v678_v35  ;;  %v677_v36 = vadd.f32 %v675_v0, %v665_v29 }
 0x161   : > { %v679_v37 = vmul.f32 0.7978846, %v677_v36 }
 0x163   : > { %1090 = vtanh.f32 %v679_v37 }
 0x16c   : > { %v1089_v38 = vpop.eup %1088 }
 0x16d   : > { %v682_v39 = vadd.f32 1.0, %v1089_v38 }
 0x16f   : > { %v684_v42 = vmul.f32 %v682_v39, %v668_v40 }
 0x170   : > { %v1091_v41 = vpop.eup %1090 }
 0x171   : > { %v683_v44 = vadd.f32 1.0, %v1091_v41  ;;  %v696_v46 = vmul.f32 %v684_v42, %v684_v42 }
 0x173   : > { %v685_v45 = vmul.f32 %v683_v44, %v669_v43 }
 0x175   : > { %v697_v47 = vmul.f32 %v685_v45, %v685_v45  ;;  %v948_v48 = vpack.c.bf16 %v685_v45, %v684_v42 }
 0x177   : > { %v699_v49 = vadd.f32 %v697_v47, %v696_v46  ;;  %949 = vst [vmem:[%s385_s16] sm:$0xff] %v948_v48  }
 0x178   : > { %1213 = shalt.err (!%p1210_p13)
}
 0x179   : > { %s1214_s6 = scalar_lea.hbm %s1635_s20, 128  ;;  %s1218_s30 = scalar_lea.hbm %s1754_s2, 256 }
 0x17a   : > { %p1215_p4 = scmp.ne.s32.totalorder %s1635_s20, %s1214_s6  ;;  %p1219_p2 = scmp.lt.s32.totalorder %s1635_s20, %s1754_s2 }
 0x17b   : > { %p1220_p6 = scmp.lt.s32.totalorder %s1218_s30, %s1214_s6 }
 0x17c   : > { %p1216_p9 = pnand %p1215_p4, %p1755_p0 }
 0x17d   : > { %p1221_p11 = por %p1220_p6, %p1219_p2 }
 0x17e   : > { %p1217_p8 = pneg %p1216_p9 }
 0x180   : > { %p1222_p1 = pnand %p1221_p11, %p1217_p8 }
 0x182   : > { %1225 = shalt.err (!%p1222_p1)
}
 0x183   : > { %s1335_s13 = smov 64   ;;  %s1336_s8 = smov 4   ;;  %v700_v50 = vrot.slane %v699_v49, 4  ;;  %v698_v55 = vld [vmem:[%s1622_s14] sm:$0x1] }
 0x184   : > { %991 = dma.vmem_to_hbm [thread:$0]  (%p1755_p0), %s1637_s9, 128, %s1635_s20, %s709_s10, %s1335_s13, %s1335_s13, %s1336_s8  }
 0x185   : > { %v701_v51 = vadd.f32 %v700_v50, %v699_v49  ;;  %s938_s16 = sshll.u32 %s1314_s27, 4  ;;  %s744_s18 = sshll.u32 %s1622_s14, 4  ;;  %s745_s18 = int_to_ptr.vmem [resolvable:$true] %s744_s18 }
 0x186   : > { %s1756_s22 = sld [smem:[#allocation27_spill]]  ;;  %s714_s0 = scalar_lea.sflag [#allocation12], %s1524_s4 }
 0x187   : > { %v702_v52 = vrot.slane %v701_v51, 2  ;;  %s1226_s6 = scalar_lea.vmem %s745_s18, 16  ;;  %s1337_s9 = smov [#allocation11]  }
 0x188   : > { %p1227_p10 = scmp.ne.s32.totalorder %s745_s18, %s1226_s6  ;;  %s1230_s20 = sshll.u32 %s1337_s9, 4  ;;  %s1231_s20 = int_to_ptr.vmem [resolvable:$false] %s1230_s20 }
 0x189   : > { %v703_v53 = vadd.f32 %v702_v52, %v701_v51  ;;  %s1232_s10 = scalar_lea.vmem %s1231_s20, 32  ;;  %p1233_p7 = scmp.lt.s32.totalorder %s745_s18, %s1231_s20 }
 0x18a   : > { %p1228_p5 = pnand %p1227_p10, %p1755_p0  ;;  %p1234_p12 = scmp.lt.s32.totalorder %s1232_s10, %s1226_s6 }
 0x18b   : > { %v704_v54 = vrot.slane %v703_v53, 1 }
 0x18c   : > { %s742_s15 = scalar_lea.hbm %s1756_s22, %s938_s16  ;;  %p1229_p3 = pneg %p1228_p5 }
 0x18d   : > { %v705_v56 = vadd.f32 %v704_v54, %v703_v53  ;;  %p1235_p13 = por %p1234_p12, %p1233_p7 }
 0x18f   : > { %v706_v57 = vadd.f32 %v705_v56, %v698_v55  ;;  %p1236_p4 = pnand %p1235_p13, %p1229_p3 }
 0x191   : > { %707 = vst [vmem:[%s1622_s14] sm:$0x1] %v706_v57 }
 0x192   : > { %1239 = shalt.err (!%p1236_p4)
}
 0x193   : > { %s1240_s27 = scalar_lea.hbm %s742_s15, 16  ;;  %s1244_s7 = scalar_lea.hbm %s1756_s22, 32 }
 0x194   : > { %p1241_p9 = scmp.ne.s32.totalorder %s742_s15, %s1240_s27  ;;  %p1245_p6 = scmp.lt.s32.totalorder %s742_s15, %s1756_s22 }
 0x195   : > { %p1246_p11 = scmp.lt.s32.totalorder %s1244_s7, %s1240_s27 }
 0x196   : > { %p1242_p8 = pnand %p1241_p9, %p1755_p0 }
 0x197   : > { %p1247_p1 = por %p1246_p11, %p1245_p6 }
 0x198   : > { %p1243_p2 = pneg %p1242_p8 }
 0x19a   : > { %p1248_p10 = pnand %p1247_p1, %p1243_p2 }
 0x19c   : > { %1251 = shalt.err (!%p1248_p10)
}
 0x19d   : > { %992 = dma.vmem_to_hbm [thread:$0]  (%p1755_p0), %s745_s18, 16, %s742_s15, %s714_s0  }
 0x19e PF: > { %s1757_s11 = sld [smem:[#allocation19_spill]]  ;;  %p1760_p3 = scmp.ge.s32.totalorder %s1322_s29, 2 }
 0x19f   : > { %s1758_s17 = sld [smem:[#allocation21_spill]] }
 0x1a4   : > { %s756_s13 = sand.u32 1, %s1757_s11  }
 0x1a5   : > { %p1759_p5 = scmp.ne.s32.totalorder %s1758_s17, 0  ;;  %s757_s8 = scalar_lea.sflag [#allocation4], %s756_s13 }
 0x1a7   : > { %p1010_p7 = pnand %p1760_p3, %p1759_p5 }
 0x1a9   : > { %p1011_p12 = pneg %p1010_p7 }
 0x1ab   : > { %1293 = dma.done.wait (%p1011_p12), %s757_s8, 128  }
 0x1ac   : > { %1295 = vsyncadd (%p1011_p12), %s757_s8, 4294967168  ;;  %s766_s16 = scalar_lea.sflag [#allocation12], %s756_s13 }
 0x1ad   : > { %1297 = dma.done.wait (%p1011_p12), %s766_s16, 16  }
 0x1ae   : > { %1299 = vsyncadd (%p1011_p12), %s766_s16, 4294967280  ;;  %s31_s29 = sadd.s32 1, %s1322_s29   ;;  %s1761_s23 = sld [smem:[#allocation22_spill]] }
 0x1af   : > { %p28_p13 = scmp.ge.s32.totalorder %s31_s29, 4   ;;  %s1762_s24 = smov %s1306_s25 }
 0x1b0   : > { %s1763_s25 = smov %s1310_s26  ;;  %s1764_s26 = smov %s1508_s19 }
 0x1b1   : > { %s1765_s27 = smov %s1318_s28  ;;  %30 = sbr.rel (!%p28_p13) target bundleno = 17 (0x11), region = 131 }
 0x1b4   : > { %s1766_s28 = smov %s1761_s23 }
 0x1b6   :  { %770 = vsyncpa [#allocation3], 1 }
 0x1b7   :  { %772 = vsyncpa [#allocation3 + $0x1], 1 }
 0x1b8   :  { %773 = vsyncpa [#allocation6], 1 }
 0x1b9   :  { %775 = vsyncpa [#allocation6 + $0x1], 1 }
 0x1ba   :  { %776 = vsyncpa [#allocation9], 1 }
 0x1bb   :  { %777 = vsyncpa [#allocation4], 1 }
 0x1bc   :  { %779 = vsyncpa [#allocation4 + $0x1], 1 }
 0x1bd   :  { %780 = vsyncpa [#allocation12], 1 }
 0x1be   :  { %782 = vsyncpa [#allocation12 + $0x1], 1 }

</bundles_post_ra>
